<compile_context>
chip_gen: v7x
topology: tpu7x:2x2x1
jax: 0.10.0
libtpu: 0.0.40
codegen_flags: <defaults>
</compile_context>

<pallas_src>
import functools

import jax
import jax.numpy as jnp
from jax.experimental import pallas as pl
from jax.experimental.pallas import tpu as pltpu


def _round_up(n, m):
    return ((n + m - 1) // m) * m


def dqn_kernel(x_ref, w1_ref, b1_ref, w2_ref, b2_ref,
               w21_ref, b21_ref, w3_ref, b3_ref, o_ref):
    # fc1 + ReLU  (bf16 operands, f32 accumulate on the MXU)
    h = jnp.dot(x_ref[...].astype(jnp.bfloat16), w1_ref[...],
                preferred_element_type=jnp.float32) + b1_ref[...]
    h = jnp.maximum(h, 0.0)
    # fc2 + ReLU
    h = jnp.dot(h.astype(jnp.bfloat16), w2_ref[...],
                preferred_element_type=jnp.float32) + b2_ref[...]
    h = jnp.maximum(h, 0.0)
    # fc21 + ReLU
    h = jnp.dot(h.astype(jnp.bfloat16), w21_ref[...],
                preferred_element_type=jnp.float32) + b21_ref[...]
    h = jnp.maximum(h, 0.0)
    # fc3 (no activation)
    o_ref[...] = jnp.dot(h.astype(jnp.bfloat16), w3_ref[...],
                         preferred_element_type=jnp.float32) + b3_ref[...]


def prepare_params(params):
    """One-time weight prep: zero-pad + cast weights to bf16 (biases stay f32).

    Called once after init, NOT inside the per-call jit, so no weight bytes
    are re-read/re-written in HBM on every forward.
    """
    (w1, b1), (w2, b2), (w21, b21), (w3, b3) = (
        params["fc1"], params["fc2"], params["fc21"], params["fc3"])
    D_in, H1 = w1.shape
    H2, H3, D_out = w2.shape[1], w21.shape[1], w3.shape[1]

    H1p = _round_up(H1, 8)        # 404 -> 408 (sublane dim of w2); not 512
    H2p = _round_up(H2, 128)      # 1600 (already aligned)
    H3p = _round_up(H3, 8)        # 64
    D_out_p = _round_up(D_out, 128)  # lane-dense output store (tiny cost)

    def pad2(a, r, c, dtype):
        a = jnp.asarray(a, jnp.float32)
        return jnp.pad(a, ((0, r - a.shape[0]), (0, c - a.shape[1]))).astype(dtype)

    prepared = {
        "w1": pad2(w1, D_in, H1p, jnp.bfloat16),
        "w2": pad2(w2, H1p, H2p, jnp.bfloat16),
        "w21": pad2(w21, H2p, H3p, jnp.bfloat16),
        "w3": pad2(w3, H3p, D_out_p, jnp.bfloat16),
        "b1": pad2(b1.reshape(1, -1), 1, H1p, jnp.float32),
        "b2": pad2(b2.reshape(1, -1), 1, H2p, jnp.float32),
        "b21": pad2(b21.reshape(1, -1), 1, H3p, jnp.float32),
        "b3": pad2(b3.reshape(1, -1), 1, D_out_p, jnp.float32),
    }
    return jax.tree.map(jax.device_put, prepared)


@functools.partial(jax.jit, static_argnames=("output_size",))
def dqn_forward(x, prepared, output_size):
    """x: [B, input_size] float32. prepared: output of prepare_params()."""
    w1, b1 = prepared["w1"], prepared["b1"]
    w2, b2 = prepared["w2"], prepared["b2"]
    w21, b21 = prepared["w21"], prepared["b21"]
    w3, b3 = prepared["w3"], prepared["b3"]

    B, D_in = x.shape
    D_out_p = w3.shape[1]

    # Batch tiling: single fused block for small batches; for large batches a
    # grid over batch keeps the weights VMEM-resident (constant index_map)
    # while each TensorCore takes a slice of the batch ("parallel").
    TB = 256 if B > 256 else _round_up(B, 8)
    Bp = _round_up(B, TB)
    xp = jnp.pad(x.astype(jnp.float32), ((0, Bp - B), (0, 0)))

    def full(a):
        return pl.BlockSpec(a.shape, lambda i: (0, 0))

    out_p = pl.pallas_call(
        dqn_kernel,
        out_shape=jax.ShapeDtypeStruct((Bp, D_out_p), jnp.float32),
        grid=(Bp // TB,),
        in_specs=[
            pl.BlockSpec((TB, D_in), lambda i: (i, 0)),
            full(w1), full(b1),
            full(w2), full(b2),
            full(w21), full(b21),
            full(w3), full(b3),
        ],
        out_specs=pl.BlockSpec((TB, D_out_p), lambda i: (i, 0)),
        compiler_params=pltpu.CompilerParams(
            dimension_semantics=("parallel",)),
    )(xp, w1, b1, w2, b2, w21, b21, w3, b3)

    return out_p[:B, :output_size]


def init_dqn_params(key, input_size, output_size):
    """Deterministic PyTorch-Linear-style init: U(-1/sqrt(fan_in), +1/sqrt(fan_in))."""
    sizes = [("fc1", input_size, 404), ("fc2", 404, 1600),
             ("fc21", 1600, 64), ("fc3", 64, output_size)]
    params = {}
    for name, fan_in, fan_out in sizes:
        key, kw, kb = jax.random.split(key, 3)
        bound = 1.0 / jnp.sqrt(jnp.float32(fan_in))
        W = jax.random.uniform(kw, (fan_in, fan_out), jnp.float32, -bound, bound)
        b = jax.random.uniform(kb, (fan_out,), jnp.float32, -bound, bound)
        params[name] = (W, b)
    return params


def dqn_reference(x, params):
    (w1, b1), (w2, b2), (w21, b21), (w3, b3) = (
        params["fc1"], params["fc2"], params["fc21"], params["fc3"])
    h = jnp.maximum(x @ w1 + b1, 0.0)
    h = jnp.maximum(h @ w2 + b2, 0.0)
    h = jnp.maximum(h @ w21 + b21, 0.0)
    return h @ w3 + b3


if __name__ == "__main__":
    input_size = 16
    output_size = 4
    batch = 2

    key = jax.random.PRNGKey(0)
    key, kx = jax.random.split(key)
    x = jax.random.normal(kx, (batch, input_size), jnp.float32)
    params = init_dqn_params(key, input_size, output_size)

    prepared = prepare_params(params)          # one-time pad + bf16 cast
    out = dqn_forward(x, prepared, output_size)
    out = jax.block_until_ready(out)

    ref = dqn_reference(x, params)             # full-f32 reference
    assert out.shape == (batch, output_size), out.shape
    # bf16 weight/activation streaming -> loose-but-safe tolerance vs f32 ref.
    assert jnp.allclose(out, ref, atol=2e-2, rtol=2e-2), (out, ref)

    print("KERNEL_OK")
</pallas_src>

<mosaic_0001>
module attributes {stable_mosaic.version = 11 : i64} {
  func.func @dqn_kernel(%arg0: i32, %arg1: memref<8x16xf32, #tpu.memory_space<vmem>>, %arg2: memref<16x408xbf16, #tpu.memory_space<vmem>>, %arg3: memref<1x408xf32, #tpu.memory_space<vmem>>, %arg4: memref<408x1664xbf16, #tpu.memory_space<vmem>>, %arg5: memref<1x1664xf32, #tpu.memory_space<vmem>>, %arg6: memref<1664x64xbf16, #tpu.memory_space<vmem>>, %arg7: memref<1x64xf32, #tpu.memory_space<vmem>>, %arg8: memref<64x128xbf16, #tpu.memory_space<vmem>>, %arg9: memref<1x128xf32, #tpu.memory_space<vmem>>, %arg10: memref<8x128xf32, #tpu.memory_space<vmem>>) attributes {dimension_semantics = [#tpu.dimension_semantics<parallel>], iteration_bounds = array<i64: 1>, scalar_prefetch = 0 : i64, scratch_operands = 0 : i64, tpu.core_type = #tpu.core_type<tc>, window_params = [{transform_indices = @transform_0, window_bounds = array<i64: 8, 16>}, {pipeline_mode = #tpu.pipeline_mode<synchronous>, transform_indices = @transform_1, window_bounds = array<i64: 16, 408>}, {pipeline_mode = #tpu.pipeline_mode<synchronous>, transform_indices = @transform_2, window_bounds = array<i64: 1, 408>}, {pipeline_mode = #tpu.pipeline_mode<synchronous>, transform_indices = @transform_3, window_bounds = array<i64: 408, 1664>}, {pipeline_mode = #tpu.pipeline_mode<synchronous>, transform_indices = @transform_4, window_bounds = array<i64: 1, 1664>}, {pipeline_mode = #tpu.pipeline_mode<synchronous>, transform_indices = @transform_5, window_bounds = array<i64: 1664, 64>}, {pipeline_mode = #tpu.pipeline_mode<synchronous>, transform_indices = @transform_6, window_bounds = array<i64: 1, 64>}, {pipeline_mode = #tpu.pipeline_mode<synchronous>, transform_indices = @transform_7, window_bounds = array<i64: 64, 128>}, {pipeline_mode = #tpu.pipeline_mode<synchronous>, transform_indices = @transform_8, window_bounds = array<i64: 1, 128>}, {transform_indices = @transform_9, window_bounds = array<i64: 8, 128>}]} {
    %c0 = arith.constant 0 : index
    %c0_0 = arith.constant 0 : index
    %0 = vector.load %arg1[%c0, %c0_0] : memref<8x16xf32, #tpu.memory_space<vmem>>, vector<8x16xf32>
    %1 = arith.truncf %0 : vector<8x16xf32> to vector<8x16xbf16>
    %c0_1 = arith.constant 0 : index
    %c0_2 = arith.constant 0 : index
    %2 = vector.load %arg2[%c0_1, %c0_2] : memref<16x408xbf16, #tpu.memory_space<vmem>>, vector<16x408xbf16>
    %cst = arith.constant dense<0.000000e+00> : vector<8x408xf32>
    %3 = tpu.matmul %1, %2, %cst {dimension_numbers = #tpu.dot_dimension_numbers<[1], [0], [0], [1], [0, 0, 1, 1], [], []>} : vector<8x16xbf16>, vector<16x408xbf16>, vector<8x408xf32> -> vector<8x408xf32>
    %c0_3 = arith.constant 0 : index
    %c0_4 = arith.constant 0 : index
    %4 = vector.load %arg3[%c0_3, %c0_4] : memref<1x408xf32, #tpu.memory_space<vmem>>, vector<1x408xf32>
    %5 = vector.broadcast %4 : vector<1x408xf32> to vector<8x408xf32>
    %6 = arith.addf %3, %5 : vector<8x408xf32>
    %cst_5 = arith.constant 0.000000e+00 : f32
    %7 = vector.broadcast %cst_5 : f32 to vector<8x408xf32>
    %8 = arith.maximumf %6, %7 : vector<8x408xf32>
    %9 = arith.truncf %8 : vector<8x408xf32> to vector<8x408xbf16>
    %c0_6 = arith.constant 0 : index
    %c0_7 = arith.constant 0 : index
    %10 = vector.load %arg4[%c0_6, %c0_7] : memref<408x1664xbf16, #tpu.memory_space<vmem>>, vector<408x1664xbf16>
    %cst_8 = arith.constant dense<0.000000e+00> : vector<8x1664xf32>
    %11 = tpu.matmul %9, %10, %cst_8 {dimension_numbers = #tpu.dot_dimension_numbers<[1], [0], [0], [1], [0, 0, 1, 1], [], []>} : vector<8x408xbf16>, vector<408x1664xbf16>, vector<8x1664xf32> -> vector<8x1664xf32>
    %c0_9 = arith.constant 0 : index
    %c0_10 = arith.constant 0 : index
    %12 = vector.load %arg5[%c0_9, %c0_10] : memref<1x1664xf32, #tpu.memory_space<vmem>>, vector<1x1664xf32>
    %13 = vector.broadcast %12 : vector<1x1664xf32> to vector<8x1664xf32>
    %14 = arith.addf %11, %13 : vector<8x1664xf32>
    %cst_11 = arith.constant 0.000000e+00 : f32
    %15 = vector.broadcast %cst_11 : f32 to vector<8x1664xf32>
    %16 = arith.maximumf %14, %15 : vector<8x1664xf32>
    %17 = arith.truncf %16 : vector<8x1664xf32> to vector<8x1664xbf16>
    %c0_12 = arith.constant 0 : index
    %c0_13 = arith.constant 0 : index
    %18 = vector.load %arg6[%c0_12, %c0_13] : memref<1664x64xbf16, #tpu.memory_space<vmem>>, vector<1664x64xbf16>
    %cst_14 = arith.constant dense<0.000000e+00> : vector<8x64xf32>
    %19 = tpu.matmul %17, %18, %cst_14 {dimension_numbers = #tpu.dot_dimension_numbers<[1], [0], [0], [1], [0, 0, 1, 1], [], []>} : vector<8x1664xbf16>, vector<1664x64xbf16>, vector<8x64xf32> -> vector<8x64xf32>
    %c0_15 = arith.constant 0 : index
    %c0_16 = arith.constant 0 : index
    %20 = vector.load %arg7[%c0_15, %c0_16] : memref<1x64xf32, #tpu.memory_space<vmem>>, vector<1x64xf32>
    %21 = vector.broadcast %20 : vector<1x64xf32> to vector<8x64xf32>
    %22 = arith.addf %19, %21 : vector<8x64xf32>
    %cst_17 = arith.constant 0.000000e+00 : f32
    %23 = vector.broadcast %cst_17 : f32 to vector<8x64xf32>
    %24 = arith.maximumf %22, %23 : vector<8x64xf32>
    %25 = arith.truncf %24 : vector<8x64xf32> to vector<8x64xbf16>
    %c0_18 = arith.constant 0 : index
    %c0_19 = arith.constant 0 : index
    %26 = vector.load %arg8[%c0_18, %c0_19] : memref<64x128xbf16, #tpu.memory_space<vmem>>, vector<64x128xbf16>
    %cst_20 = arith.constant dense<0.000000e+00> : vector<8x128xf32>
    %27 = tpu.matmul %25, %26, %cst_20 {dimension_numbers = #tpu.dot_dimension_numbers<[1], [0], [0], [1], [0, 0, 1, 1], [], []>} : vector<8x64xbf16>, vector<64x128xbf16>, vector<8x128xf32> -> vector<8x128xf32>
    %c0_21 = arith.constant 0 : index
    %c0_22 = arith.constant 0 : index
    %28 = vector.load %arg9[%c0_21, %c0_22] : memref<1x128xf32, #tpu.memory_space<vmem>>, vector<1x128xf32>
    %29 = vector.broadcast %28 : vector<1x128xf32> to vector<8x128xf32>
    %30 = arith.addf %27, %29 : vector<8x128xf32>
    %c0_23 = arith.constant 0 : index
    %c0_24 = arith.constant 0 : index
    %31 = vector.load %arg10[%c0_23, %c0_24] : memref<8x128xf32, #tpu.memory_space<vmem>>, vector<8x128xf32>
    tpu.vector_store %arg10[%c0_23, %c0_24], %30 {strides = array<i32>} : memref<8x128xf32, #tpu.memory_space<vmem>>, vector<8x128xf32>,
    return
  }
  func.func @transform_0(%arg0: i32) -> (i32, i32) {
    %c0_i32 = arith.constant 0 : i32
    %c0_i32_0 = arith.constant 0 : i32
    return %arg0, %c0_i32 : i32, i32
  }
  func.func @transform_1(%arg0: i32) -> (i32, i32) {
    %c0_i32 = arith.constant 0 : i32
    %c0_i32_0 = arith.constant 0 : i32
    %c0_i32_1 = arith.constant 0 : i32
    return %c0_i32, %c0_i32_0 : i32, i32
  }
  func.func @transform_2(%arg0: i32) -> (i32, i32) {
    %c0_i32 = arith.constant 0 : i32
    %c0_i32_0 = arith.constant 0 : i32
    %c0_i32_1 = arith.constant 0 : i32
    return %c0_i32, %c0_i32_0 : i32, i32
  }
  func.func @transform_3(%arg0: i32) -> (i32, i32) {
    %c0_i32 = arith.constant 0 : i32
    %c0_i32_0 = arith.constant 0 : i32
    %c0_i32_1 = arith.constant 0 : i32
    return %c0_i32, %c0_i32_0 : i32, i32
  }
  func.func @transform_4(%arg0: i32) -> (i32, i32) {
    %c0_i32 = arith.constant 0 : i32
    %c0_i32_0 = arith.constant 0 : i32
    %c0_i32_1 = arith.constant 0 : i32
    return %c0_i32, %c0_i32_0 : i32, i32
  }
  func.func @transform_5(%arg0: i32) -> (i32, i32) {
    %c0_i32 = arith.constant 0 : i32
    %c0_i32_0 = arith.constant 0 : i32
    %c0_i32_1 = arith.constant 0 : i32
    return %c0_i32, %c0_i32_0 : i32, i32
  }
  func.func @transform_6(%arg0: i32) -> (i32, i32) {
    %c0_i32 = arith.constant 0 : i32
    %c0_i32_0 = arith.constant 0 : i32
    %c0_i32_1 = arith.constant 0 : i32
    return %c0_i32, %c0_i32_0 : i32, i32
  }
  func.func @transform_7(%arg0: i32) -> (i32, i32) {
    %c0_i32 = arith.constant 0 : i32
    %c0_i32_0 = arith.constant 0 : i32
    %c0_i32_1 = arith.constant 0 : i32
    return %c0_i32, %c0_i32_0 : i32, i32
  }
  func.func @transform_8(%arg0: i32) -> (i32, i32) {
    %c0_i32 = arith.constant 0 : i32
    %c0_i32_0 = arith.constant 0 : i32
    %c0_i32_1 = arith.constant 0 : i32
    return %c0_i32, %c0_i32_0 : i32, i32
  }
  func.func @transform_9(%arg0: i32) -> (i32, i32) {
    %c0_i32 = arith.constant 0 : i32
    %c0_i32_0 = arith.constant 0 : i32
    return %arg0, %c0_i32 : i32, i32
  }
}

</mosaic_0001>

<bundles_post_ra>
// kernel: dqn_forward.1
= control target key start
LH: loop header
LB: loop body
LE: loop exit
PB: predicated region body
PF: predicated region fallthrough
CT: control target
= control target key end

     0   :  { %14 = vsyncpa [#allocation3], 0  ;;  %s6319_s0 = inlined_call_operand.vmem [shape: f32[8,16], index: 0, kind: input, shape index: {}]   ;;  %s6320_s1 = inlined_call_operand.hbm [shape: bf16[16,408], index: 1, kind: input, shape index: {}]   ;;  %s6321_s2 = inlined_call_operand.hbm [shape: f32[1,408], index: 2, kind: input, shape index: {}]   ;;  %s6322_s3 = inlined_call_operand.hbm [shape: bf16[408,1664], index: 3, kind: input, shape index: {}]   ;;  %s6323_s4 = inlined_call_operand.hbm [shape: f32[1,1664], index: 4, kind: input, shape index: {}]   ;;  %s6324_s5 = inlined_call_operand.vmem [shape: bf16[1664,64], index: 5, kind: input, shape index: {}]   ;;  %s6325_s6 = inlined_call_operand.hbm [shape: f32[1,64], index: 6, kind: input, shape index: {}]   ;;  %s6326_s7 = inlined_call_operand.hbm [shape: bf16[64,128], index: 7, kind: input, shape index: {}]   ;;  %s6327_s8 = inlined_call_operand.hbm [shape: f32[1,128], index: 8, kind: input, shape index: {}]   ;;  %s6328_s9 = inlined_call_operand.vmem [shape: f32[8,128], index: 9, kind: output, shape index: {}]  }
   0x1   :  { %15 = vsyncpa [#allocation5], 0 }
   0x2   :  { %16 = vsyncpa [#allocation8], 0 }
   0x3   :  { %17 = vsyncpa [#allocation11], 0  ;;  %s5710_s30 = smov [#allocation4]   ;;  %s5711_s11 = smov [#allocation7]  }
   0x4   :  { %s38_s10 = sshll.u32 %s5710_s30, 4  ;;  %s60_s12 = sshll.u32 %s5711_s11, 4  ;;  %s39_s10 = int_to_ptr.vmem [resolvable:$true] %s38_s10  ;;  %s61_s12 = int_to_ptr.vmem [resolvable:$true] %s60_s12 }
   0x5   :  { %s5548_s15 = scalar_lea.hbm %s6321_s2, 64 }
   0x6   :  { %p5549_p0 = scmp.ne.s32.totalorder %s6321_s2, %s5548_s15  ;;  %p5552_p1 = scmp.lt.u32.totalorder %s5548_s15, %s6321_s2 }
   0x8   :  { %p5554_p2 = pnand %p5552_p1, %p5549_p0 }
   0xa   :  { %5557 = shalt.err (!%p5554_p2)
}
   0xb   :  { %s5558_s20 = scalar_lea.vmem %s39_s10, 64  ;;  %p5563_p4 = scmp.lt.s32.totalorder %s39_s10, %s39_s10 }
   0xc   :  { %p5559_p3 = scmp.ne.s32.totalorder %s39_s10, %s5558_s20  ;;  %p5564_p5 = scmp.lt.s32.totalorder %s5558_s20, %s5558_s20 }
   0xe   :  { %p5565_p6 = por %p5564_p5, %p5563_p4 }
  0x10   :  { %p5566_p7 = pnand %p5565_p6, %p5559_p3 }
  0x12   :  { %5569 = shalt.err (!%p5566_p7)
}
  0x13   :  { %41 = dma.hbm_to_vmem [thread:$0]  %s6321_s2, 64, %s39_s10, [#allocation5]  }
  0x14   :  { %s5570_s25 = scalar_lea.hbm %s6323_s4, 208 }
  0x15   :  { %p5571_p8 = scmp.ne.s32.totalorder %s6323_s4, %s5570_s25  ;;  %p5574_p9 = scmp.lt.u32.totalorder %s5570_s25, %s6323_s4 }
  0x17   :  { %p5576_p10 = pnand %p5574_p9, %p5571_p8 }
  0x19   :  { %5579 = shalt.err (!%p5576_p10)
}
  0x1a   :  { %s5580_s30 = scalar_lea.vmem %s61_s12, 208  ;;  %s5584_s11 = scalar_lea.vmem %s61_s12, 224 }
  0x1b   :  { %p5581_p11 = scmp.ne.s32.totalorder %s61_s12, %s5580_s30  ;;  %p5585_p12 = scmp.lt.s32.totalorder %s61_s12, %s61_s12 }
  0x1c   :  { %p5586_p13 = scmp.lt.s32.totalorder %s5584_s11, %s5580_s30 }
  0x1e   :  { %p5587_p0 = por %p5586_p13, %p5585_p12 }
  0x20   :  { %p5588_p1 = pnand %p5587_p0, %p5581_p11 }
  0x22   :  { %5591 = shalt.err (!%p5588_p1)
}
  0x23   :  { %63 = dma.hbm_to_vmem [thread:$0]  %s6323_s4, 208, %s61_s12, [#allocation8]  }
  0x24   :  { %s5712_s13 = smov [#allocation10]   ;;  %s5592_s17 = scalar_lea.hbm %s6326_s7, 512 }
  0x25   :  { %s81_s14 = sshll.u32 %s5712_s13, 4  ;;  %p5593_p2 = scmp.ne.s32.totalorder %s6326_s7, %s5592_s17  ;;  %s82_s14 = int_to_ptr.vmem [resolvable:$true] %s81_s14 }
  0x26   :  { %p5596_p3 = scmp.lt.u32.totalorder %s5592_s17, %s6326_s7 }
  0x28   :  { %p5598_p4 = pnand %p5596_p3, %p5593_p2 }
  0x2a   :  { %5601 = shalt.err (!%p5598_p4)
}
  0x2b   :  { %s5602_s22 = scalar_lea.vmem %s82_s14, 512  ;;  %p5607_p6 = scmp.lt.s32.totalorder %s82_s14, %s82_s14 }
  0x2c   :  { %p5603_p5 = scmp.ne.s32.totalorder %s82_s14, %s5602_s22  ;;  %p5608_p7 = scmp.lt.s32.totalorder %s5602_s22, %s5602_s22 }
  0x2e   :  { %p5609_p8 = por %p5608_p7, %p5607_p6 }
  0x30   :  { %p5610_p9 = pnand %p5609_p8, %p5603_p5 }
  0x32   :  { %5613 = shalt.err (!%p5610_p9)
}
  0x33   :  { %s5713_s4 = smov 64   ;;  %s5714_s12 = smov 4  }
  0x34   :  { %87 = dma.hbm_to_vmem [thread:$0]  %s6326_s7, 512, %s82_s14, [#allocation11], %s5713_s4, %s5713_s4, %s5714_s12  }
  0x35   :  { %s5715_s25 = smov [#allocation2]   ;;  %s5614_s29 = scalar_lea.hbm %s6320_s1, 512 }
  0x36   :  { %s25_s26 = sshll.u32 %s5715_s25, 4  ;;  %p5615_p10 = scmp.ne.s32.totalorder %s6320_s1, %s5614_s29  ;;  %s26_s26 = int_to_ptr.vmem [resolvable:$true] %s25_s26 }
  0x37   :  { %p5618_p11 = scmp.lt.u32.totalorder %s5614_s29, %s6320_s1 }
  0x39   :  { %p5620_p12 = pnand %p5618_p11, %p5615_p10 }
  0x3b   :  { %5623 = shalt.err (!%p5620_p12)
}
  0x3c   :  { %s5624_s13 = scalar_lea.vmem %s26_s26, 512  ;;  %p5629_p0 = scmp.lt.s32.totalorder %s26_s26, %s26_s26 }
  0x3d   :  { %p5625_p13 = scmp.ne.s32.totalorder %s26_s26, %s5624_s13  ;;  %p5630_p1 = scmp.lt.s32.totalorder %s5624_s13, %s5624_s13 }
  0x3f   :  { %p5631_p2 = por %p5630_p1, %p5629_p0 }
  0x41   :  { %p5632_p3 = pnand %p5631_p2, %p5625_p13 }
  0x43   :  { %5635 = shalt.err (!%p5632_p3)
}
  0x44   :  { %s5716_s7 = smov 256   ;;  %s5717_s14 = smov 16  }
  0x45   :  { %31 = dma.hbm_to_vmem [thread:$0]  %s6320_s1, 512, %s26_s26, [#allocation3], %s5716_s7, %s5716_s7, %s5717_s14  }
  0x46   :  { %s5718_s17 = smov [#allocation6]   ;;  %s5636_s21 = scalar_lea.hbm %s6322_s3, 42432 }
  0x47   :  { %s47_s18 = sshll.u32 %s5718_s17, 4  ;;  %p5637_p4 = scmp.ne.s32.totalorder %s6322_s3, %s5636_s21  ;;  %s48_s18 = int_to_ptr.vmem [resolvable:$true] %s47_s18 }
  0x48   :  { %p5640_p5 = scmp.lt.u32.totalorder %s5636_s21, %s6322_s3 }
  0x4a   :  { %p5642_p6 = pnand %p5640_p5, %p5637_p4 }
  0x4c   :  { %5645 = shalt.err (!%p5642_p6)
}
  0x4d   :  { %s5646_s24 = scalar_lea.vmem %s48_s18, 42432  ;;  %p5651_p8 = scmp.lt.s32.totalorder %s48_s18, %s48_s18 }
  0x4e   :  { %p5647_p7 = scmp.ne.s32.totalorder %s48_s18, %s5646_s24  ;;  %p5652_p9 = scmp.lt.s32.totalorder %s5646_s24, %s5646_s24 }
  0x50   :  { %p5653_p10 = por %p5652_p9, %p5651_p8 }
  0x52   :  { %p5654_p11 = pnand %p5653_p10, %p5647_p7 }
  0x54   :  { %5657 = shalt.err (!%p5654_p11)
}
  0x55   :  { %s5719_s1 = smov 832   ;;  %s5720_s25 = smov 52  }
  0x56   :  { %53 = dma.hbm_to_vmem [thread:$0]  %s6322_s3, 42432, %s48_s18, [#allocation5], %s5719_s1, %s5719_s1, %s5720_s25  }
  0x57   :  { %s5721_s28 = smov [#allocation9]   ;;  %s5722_s30 = smov [#allocation12]  }
  0x58   :  { %s72_s29 = sshll.u32 %s5721_s28, 4  ;;  %s94_s11 = sshll.u32 %s5722_s30, 4  ;;  %s73_s29 = int_to_ptr.vmem [resolvable:$true] %s72_s29  ;;  %s95_s11 = int_to_ptr.vmem [resolvable:$true] %s94_s11 }
  0x59   :  { %s5658_s13 = scalar_lea.hbm %s6325_s6, 16 }
  0x5a   :  { %p5659_p12 = scmp.ne.s32.totalorder %s6325_s6, %s5658_s13  ;;  %p5662_p13 = scmp.lt.u32.totalorder %s5658_s13, %s6325_s6 }
  0x5c   :  { %p5664_p0 = pnand %p5662_p13, %p5659_p12 }
  0x5e   :  { %5667 = shalt.err (!%p5664_p0)
}
  0x5f   :  { %s5668_s3 = scalar_lea.vmem %s73_s29, 16  ;;  %s5672_s17 = scalar_lea.vmem %s73_s29, 32 }
  0x60   :  { %p5669_p1 = scmp.ne.s32.totalorder %s73_s29, %s5668_s3  ;;  %p5673_p2 = scmp.lt.s32.totalorder %s73_s29, %s73_s29 }
  0x61   :  { %p5674_p3 = scmp.lt.s32.totalorder %s5672_s17, %s5668_s3 }
  0x63   :  { %p5675_p4 = por %p5674_p3, %p5673_p2 }
  0x65   :  { %p5676_p5 = pnand %p5675_p4, %p5669_p1 }
  0x67   :  { %5679 = shalt.err (!%p5676_p5)
}
  0x68   :  { %75 = dma.hbm_to_vmem [thread:$0]  %s6325_s6, 16, %s73_s29, [#allocation8]  }
  0x69   :  { %s5680_s22 = scalar_lea.hbm %s6327_s8, 16 }
  0x6a   :  { %p5681_p6 = scmp.ne.s32.totalorder %s6327_s8, %s5680_s22  ;;  %p5684_p7 = scmp.lt.u32.totalorder %s5680_s22, %s6327_s8 }
  0x6c   :  { %p5686_p8 = pnand %p5684_p7, %p5681_p6 }
  0x6e   :  { %5689 = shalt.err (!%p5686_p8)
}
  0x6f   :  { %s5690_s1 = scalar_lea.vmem %s95_s11, 16  ;;  %s5694_s25 = scalar_lea.vmem %s95_s11, 32 }
  0x70   :  { %p5691_p9 = scmp.ne.s32.totalorder %s95_s11, %s5690_s1  ;;  %p5695_p10 = scmp.lt.s32.totalorder %s95_s11, %s95_s11 }
  0x71   :  { %p5696_p11 = scmp.lt.s32.totalorder %s5694_s25, %s5690_s1 }
  0x73   :  { %p5697_p12 = por %p5696_p11, %p5695_p10 }
  0x75   :  { %p5698_p13 = pnand %p5697_p12, %p5691_p9 }
  0x77   :  { %5701 = shalt.err (!%p5698_p13)
}
  0x78   :  { %97 = dma.hbm_to_vmem [thread:$0]  %s6327_s8, 16, %s95_s11, [#allocation11]  }
  0x79   :  { %5702 = dma.done.wait [#allocation3], 512  }
  0x7a   :  { %5703 = vsyncadd [#allocation3], 4294966784 }
  0x7b   :  { %5704 = dma.done.wait [#allocation5], 42496  }
  0x7c   :  { %5705 = vsyncadd [#allocation5], 4294924800 }
  0x7d   :  { %5706 = dma.done.wait [#allocation8], 224  }
  0x7e   :  { %5707 = vsyncadd [#allocation8], 4294967072 }
  0x7f   :  { %5708 = dma.done.wait [#allocation11], 528  }
  0x80   :  { %5709 = vsyncadd [#allocation11], 4294966768  ;;  %v5723_v0 = vmov 0   ;;  %v4946_v1 = vld [vmem:[#allocation2 + $0x4] ss:$16 sps:$4 sm:$0xff]   ;;  %vm168_vm0 = vcmask 130048  }
  0x81   :  { %204 = vmatprep.mubr.bf16.mxu0 %v5723_v0  ;;  %245 = vmatprep.mubr.bf16.mxu1 %v5723_v0  ;;  %v4948_v2 = vld [vmem:[#allocation2] ss:$16 sps:$4 sm:$0xff]   ;;  %v4949_v5 = vld [vmem:[#allocation2 + $0xc] ss:$16 sps:$4 sm:$0xff]   ;;  %v4951_v6 = vld [vmem:[#allocation2 + $0x8] ss:$16 sps:$4 sm:$0xff]  }
  0x82   :  { %v120_v3 = vld [vmem:[%s6319_s0] sm:$0xff]  ;;  %172 = vmatprep.subr.bf16.mxu0 %v4946_v1  ;;  %213 = vmatprep.subr.bf16.mxu1 %v4949_v5  ;;  %v4954_v8 = vld [vmem:[#allocation6 + $0x4] ss:$52 sps:$4 sm:$0xff]   ;;  %v4963_v13 = vld [vmem:[#allocation6 + $0x74] ss:$52 sps:$4 sm:$0xff]   ;;  %vm2371_vm1 = vcmask 195584  }
  0x83   :  { %v121_v4 = vpack.c.bf16 %v120_v3, %v120_v3  ;;  %173 = vmatpush1.bf16.msra.mxu0 %v4948_v2  ;;  %v4952_v7 = vld [vmem:[#allocation6] ss:$52 sps:$4 sm:$0xff]   ;;  %214 = vmatpush1.bf16.msra.mxu1 %v4951_v6  ;;  %v4955_v9 = vld [vmem:[#allocation6 + $0x8] ss:$52 sps:$4 sm:$0xff]   ;;  %v4961_v14 = vld [vmem:[#allocation6 + $0x70] ss:$52 sps:$4 sm:$0xff]  }
  0x84   :  { %v4957_v10 = vld [vmem:[#allocation6 + $0xc] ss:$52 sps:$4 sm:$0xff]   ;;  %2415 = vmatprep.subr.bf16.mxu0 %v4954_v8  ;;  %v4958_v12 = vld [vmem:[#allocation6 + $0x68] ss:$52 sps:$4 sm:$0xff]   ;;  %v4964_v17 = vld [vmem:[#allocation6 + $0xd0] ss:$52 sps:$4 sm:$0xff]  }
  0x85   :  { %v4960_v11 = vld [vmem:[#allocation6 + $0x6c] ss:$52 sps:$4 sm:$0xff]   ;;  %2497 = vmatprep.subr.bf16.mxu1 %v4957_v10  ;;  %v4966_v15 = vld [vmem:[#allocation6 + $0xd4] ss:$52 sps:$4 sm:$0xff]   ;;  %v4969_v16 = vld [vmem:[#allocation6 + $0xdc] ss:$52 sps:$4 sm:$0xff]   ;;  %v128_v10 = vlaneseq }
  0x86   :  { %4230 = vmatmul.mubr.msk.bf16.vlgmr.msra.gmra.mrb[0].mxu0 %vm168_vm0, %v121_v4  ;;  %4231 = vmatmul.mubr.msk.bf16.vlgmr.msra.gmra.mrb[0].mxu1 %vm168_vm0, %v121_v4  ;;  %v4972_v18 = vld [vmem:[#allocation6 + $0x13c] ss:$52 sps:$4 sm:$0xff]   ;;  %v4967_v19 = vld [vmem:[#allocation6 + $0xd8] ss:$52 sps:$4 sm:$0xff]   ;;  %v4973_v23 = vld [vmem:[#allocation6 + $0x140] ss:$52 sps:$4 sm:$0xff]  }
  0x87   :  { %2416 = vmatpush1.bf16.msra.mxu0 %v4952_v7  ;;  %2498 = vmatpush1.bf16.msra.mxu1 %v4955_v9  ;;  %v4975_v20 = vld [vmem:[#allocation6 + $0x144] ss:$52 sps:$4 sm:$0xff]   ;;  %v4981_v24 = vld [vmem:[#allocation6 + $0x1ac] ss:$52 sps:$4 sm:$0xff]   ;;  %v4979_v27 = vld [vmem:[#allocation6 + $0x1a8] ss:$52 sps:$4 sm:$0xff]  }
  0x88   :  { %2417 = vmatprep.subr.bf16.mxu0 %v4960_v11  ;;  %2499 = vmatprep.subr.bf16.mxu1 %v4963_v13  ;;  %v4970_v21 = vld [vmem:[#allocation6 + $0x138] ss:$52 sps:$4 sm:$0xff]   ;;  %v4976_v25 = vld [vmem:[#allocation6 + $0x1a0] ss:$52 sps:$4 sm:$0xff]   ;;  %v4982_v29 = vld [vmem:[#allocation6 + $0x208] ss:$52 sps:$4 sm:$0xff]  }
  0x89   :  { %v4978_v22 = vld [vmem:[#allocation6 + $0x1a4] ss:$52 sps:$4 sm:$0xff]   ;;  %v4984_v26 = vld [vmem:[#allocation6 + $0x20c] ss:$52 sps:$4 sm:$0xff]   ;;  %v4987_v28 = vld [vmem:[#allocation6 + $0x214] ss:$52 sps:$4 sm:$0xff]  }
  0x8a   :  { %v4990_v30 = vld [vmem:[#allocation6 + $0x274] ss:$52 sps:$4 sm:$0xff]   ;;  %v4985_v31 = vld [vmem:[#allocation6 + $0x210] ss:$52 sps:$4 sm:$0xff]   ;;  %v4991_v35 = vld [vmem:[#allocation6 + $0x278] ss:$52 sps:$4 sm:$0xff]  }
  0x8b   :  { %2418 = vmatpush1.bf16.msra.mxu0 %v4958_v12  ;;  %2500 = vmatpush1.bf16.msra.mxu1 %v4961_v14  ;;  %v4993_v32 = vld [vmem:[#allocation6 + $0x27c] ss:$52 sps:$4 sm:$0xff]   ;;  %v4999_v36 = vld [vmem:[#allocation6 + $0x2e4] ss:$52 sps:$4 sm:$0xff]   ;;  %v4997_v39 = vld [vmem:[#allocation6 + $0x2e0] ss:$52 sps:$4 sm:$0xff]  }
  0x8c   :  { %2419 = vmatprep.subr.bf16.mxu0 %v4966_v15  ;;  %2501 = vmatprep.subr.bf16.mxu1 %v4969_v16  ;;  %v4988_v33 = vld [vmem:[#allocation6 + $0x270] ss:$52 sps:$4 sm:$0xff]   ;;  %v4994_v37 = vld [vmem:[#allocation6 + $0x2d8] ss:$52 sps:$4 sm:$0xff]   ;;  %v5000_v41 = vld [vmem:[#allocation6 + $0x340] ss:$52 sps:$4 sm:$0xff]  }
  0x8d   :  { %v4996_v34 = vld [vmem:[#allocation6 + $0x2dc] ss:$52 sps:$4 sm:$0xff]   ;;  %v5002_v38 = vld [vmem:[#allocation6 + $0x344] ss:$52 sps:$4 sm:$0xff]   ;;  %v5005_v40 = vld [vmem:[#allocation6 + $0x34c] ss:$52 sps:$4 sm:$0xff]  }
  0x8e   :  { %v5008_v42 = vld [vmem:[#allocation6 + $0x3ac] ss:$52 sps:$4 sm:$0xff]   ;;  %v5003_v43 = vld [vmem:[#allocation6 + $0x348] ss:$52 sps:$4 sm:$0xff]   ;;  %v5009_v46 = vld [vmem:[#allocation6 + $0x3b0] ss:$52 sps:$4 sm:$0xff]  }
  0x8f   :  { %2420 = vmatpush1.bf16.msra.mxu0 %v4964_v17  ;;  %2502 = vmatpush1.bf16.msra.mxu1 %v4967_v19  ;;  %v5006_v44 = vld [vmem:[#allocation6 + $0x3a8] ss:$52 sps:$4 sm:$0xff]   ;;  %v5012_v49 = vld [vmem:[#allocation6 + $0x410] ss:$52 sps:$4 sm:$0xff]   ;;  %v5015_v51 = vld [vmem:[#allocation6 + $0x418] ss:$52 sps:$4 sm:$0xff]  }
  0x90   :  { %2421 = vmatprep.subr.bf16.mxu0 %v4972_v18  ;;  %2503 = vmatprep.subr.bf16.mxu1 %v4975_v20  ;;  %v5011_v45 = vld [vmem:[#allocation6 + $0x3b4] ss:$52 sps:$4 sm:$0xff]   ;;  %v5017_v48 = vld [vmem:[#allocation6 + $0x41c] ss:$52 sps:$4 sm:$0xff]   ;;  %v5023_v52 = vld [vmem:[#allocation6 + $0x484] ss:$52 sps:$4 sm:$0xff]  }
  0x91   :  { %v5014_v47 = vld [vmem:[#allocation6 + $0x414] ss:$52 sps:$4 sm:$0xff]   ;;  %v5020_v50 = vld [vmem:[#allocation6 + $0x47c] ss:$52 sps:$4 sm:$0xff]   ;;  %v5018_v53 = vld [vmem:[#allocation6 + $0x478] ss:$52 sps:$4 sm:$0xff]  }
  0x92   :  { %v5026_v54 = vld [vmem:[#allocation6 + $0x4e4] ss:$52 sps:$4 sm:$0xff]   ;;  %v5021_v55 = vld [vmem:[#allocation6 + $0x480] ss:$52 sps:$4 sm:$0xff]   ;;  %v5027_v59 = vld [vmem:[#allocation6 + $0x4e8] ss:$52 sps:$4 sm:$0xff]  }
  0x93   :  { %2422 = vmatpush1.bf16.msra.mxu0 %v4970_v21  ;;  %2504 = vmatpush1.bf16.msra.mxu1 %v4973_v23  ;;  %v5029_v56 = vld [vmem:[#allocation6 + $0x4ec] ss:$52 sps:$4 sm:$0xff]   ;;  %v5035_v60 = vld [vmem:[#allocation6 + $0x554] ss:$52 sps:$4 sm:$0xff]   ;;  %v5033_v62 = vld [vmem:[#allocation6 + $0x550] ss:$52 sps:$4 sm:$0xff]  }
  0x94   :  { %2423 = vmatprep.subr.bf16.mxu0 %v4978_v22  ;;  %2505 = vmatprep.subr.bf16.mxu1 %v4981_v24  ;;  %v5024_v57 = vld [vmem:[#allocation6 + $0x4e0] ss:$52 sps:$4 sm:$0xff]   ;;  %v5030_v61 = vld [vmem:[#allocation6 + $0x548] ss:$52 sps:$4 sm:$0xff]   ;;  %v5036_v2 = vld [vmem:[#allocation6 + $0x5b0] ss:$52 sps:$4 sm:$0xff]  }
  0x95   :  { %v5032_v58 = vld [vmem:[#allocation6 + $0x54c] ss:$52 sps:$4 sm:$0xff]   ;;  %v5038_v63 = vld [vmem:[#allocation6 + $0x5b4] ss:$52 sps:$4 sm:$0xff]   ;;  %v5041_v1 = vld [vmem:[#allocation6 + $0x5bc] ss:$52 sps:$4 sm:$0xff]  }
  0x96   :  { %v5039_v3 = vld [vmem:[#allocation6 + $0x5b8] ss:$52 sps:$4 sm:$0xff]   ;;  %v5044_v4 = vld [vmem:[#allocation6 + $0x61c] ss:$52 sps:$4 sm:$0xff]   ;;  %v5045_v7 = vld [vmem:[#allocation6 + $0x620] ss:$52 sps:$4 sm:$0xff]  }
  0x97   :  { %2424 = vmatpush1.bf16.msra.mxu0 %v4976_v25  ;;  %2506 = vmatpush1.bf16.msra.mxu1 %v4979_v27  ;;  %v5047_v5 = vld [vmem:[#allocation6 + $0x624] ss:$52 sps:$4 sm:$0xff]   ;;  %v5053_v9 = vld [vmem:[#allocation6 + $0x68c] ss:$52 sps:$4 sm:$0xff]   ;;  %v5865_v11 = vshrl.u32 %v128_v10, 7  ;;  %vm2375_vm2 = vcmask 1043456  }
  0x98   :  { %2425 = vmatprep.subr.bf16.mxu0 %v4984_v26  ;;  %2507 = vmatprep.subr.bf16.mxu1 %v4987_v28  ;;  %v5042_v6 = vld [vmem:[#allocation6 + $0x618] ss:$52 sps:$4 sm:$0xff]   ;;  %v5867_v12 = vld [vmem:[#allocation4] sm:$0xf]  ;;  %vm5725_vm3 = vmmov 0   ;;  %vm4173_vm4 = vcmask 523264  }
  0x99   :  { %v5050_v8 = vld [vmem:[#allocation6 + $0x684] ss:$52 sps:$4 sm:$0xff]   ;;  %v5870_v13 = vsub.s32 0, %v5865_v11  ;;  %v5873_v14 = vsub.s32 1, %v5865_v11  ;;  %v5876_v15 = vsub.s32 3, %v5865_v11 }
  0x9a   :  { %v5099_v10 = vld [vmem:[#allocation6 + $0x9c8] ss:$52 sps:$4 sm:$0xff]  }
  0x9b   :  { %2426 = vmatpush1.bf16.msra.mxu0 %v4982_v29  ;;  %2508 = vmatpush1.bf16.msra.mxu1 %v4985_v31  ;;  %v131_v16 = vrot.slane %v5867_v12, %v5870_v13  ;;  %v135_v17 = vrot.slane %v5867_v12, %v5873_v14  ;;  %v143_v19 = vrot.slane %v5867_v12, %v5876_v15  ;;  %v5048_v29 = vld [vmem:[#allocation6 + $0x680] ss:$52 sps:$4 sm:$0xff]  }
  0x9c   :  { %2427 = vmatprep.subr.bf16.mxu0 %v4990_v30  ;;  %2509 = vmatprep.subr.bf16.mxu1 %v4993_v32  ;;  %v5051_v32 = vld [vmem:[#allocation6 + $0x688] ss:$52 sps:$4 sm:$0xff]  }
  0x9f   :  { %2428 = vmatpush1.bf16.msra.mxu0 %v4988_v33  ;;  %2510 = vmatpush1.bf16.msra.mxu1 %v4991_v35 }
  0xa0   :  { %2429 = vmatprep.subr.bf16.mxu0 %v4996_v34  ;;  %2511 = vmatprep.subr.bf16.mxu1 %v4999_v36 }
  0xa3   :  { %2430 = vmatpush1.bf16.msra.mxu0 %v4994_v37  ;;  %2512 = vmatpush1.bf16.msra.mxu1 %v4997_v39  ;;  %v5056_v37 = vld [vmem:[#allocation6 + $0x6ec] ss:$52 sps:$4 sm:$0xff]   ;;  %v5054_v39 = vld [vmem:[#allocation6 + $0x6e8] ss:$52 sps:$4 sm:$0xff]  }
  0xa4   :  { %2431 = vmatprep.subr.bf16.mxu0 %v5002_v38  ;;  %2513 = vmatprep.subr.bf16.mxu1 %v5005_v40  ;;  %v5059_v38 = vld [vmem:[#allocation6 + $0x6f4] ss:$52 sps:$4 sm:$0xff]   ;;  %v5057_v40 = vld [vmem:[#allocation6 + $0x6f0] ss:$52 sps:$4 sm:$0xff]  }
  0xa7   :  { %2432 = vmatpush1.bf16.msra.mxu0 %v5000_v41  ;;  %2514 = vmatpush1.bf16.msra.mxu1 %v5003_v43  ;;  %v5065_v43 = vld [vmem:[#allocation6 + $0x75c] ss:$52 sps:$4 sm:$0xff]  }
  0xa8   :  { %2433 = vmatprep.subr.bf16.mxu0 %v5008_v42  ;;  %2515 = vmatprep.subr.bf16.mxu1 %v5011_v45  ;;  %v5062_v42 = vld [vmem:[#allocation6 + $0x754] ss:$52 sps:$4 sm:$0xff]   ;;  %v5063_v45 = vld [vmem:[#allocation6 + $0x758] ss:$52 sps:$4 sm:$0xff]  }
  0xab   :  { %2434 = vmatpush1.bf16.msra.mxu0 %v5006_v44  ;;  %2516 = vmatpush1.bf16.msra.mxu1 %v5009_v46  ;;  %v5060_v44 = vld [vmem:[#allocation6 + $0x750] ss:$52 sps:$4 sm:$0xff]  }
  0xac   :  { %2435 = vmatprep.subr.bf16.mxu0 %v5014_v47  ;;  %2517 = vmatprep.subr.bf16.mxu1 %v5017_v48  ;;  %v5068_v46 = vld [vmem:[#allocation6 + $0x7bc] ss:$52 sps:$4 sm:$0xff]   ;;  %v5071_v47 = vld [vmem:[#allocation6 + $0x7c4] ss:$52 sps:$4 sm:$0xff]  }
  0xad   :  { %v5066_v48 = vld [vmem:[#allocation6 + $0x7b8] ss:$52 sps:$4 sm:$0xff]  }
  0xaf   :  { %2436 = vmatpush1.bf16.msra.mxu0 %v5012_v49  ;;  %2518 = vmatpush1.bf16.msra.mxu1 %v5015_v51  ;;  %v5069_v49 = vld [vmem:[#allocation6 + $0x7c0] ss:$52 sps:$4 sm:$0xff]  }
  0xb0   :  { %2437 = vmatprep.subr.bf16.mxu0 %v5020_v50  ;;  %2519 = vmatprep.subr.bf16.mxu1 %v5023_v52  ;;  %v5074_v50 = vld [vmem:[#allocation6 + $0x824] ss:$52 sps:$4 sm:$0xff]   ;;  %v5077_v51 = vld [vmem:[#allocation6 + $0x82c] ss:$52 sps:$4 sm:$0xff]  }
  0xb1   :  { %v5072_v52 = vld [vmem:[#allocation6 + $0x820] ss:$52 sps:$4 sm:$0xff]  }
  0xb3   :  { %2438 = vmatpush1.bf16.msra.mxu0 %v5018_v53  ;;  %2520 = vmatpush1.bf16.msra.mxu1 %v5021_v55  ;;  %v5075_v53 = vld [vmem:[#allocation6 + $0x828] ss:$52 sps:$4 sm:$0xff]  }
  0xb4   :  { %2439 = vmatprep.subr.bf16.mxu0 %v5026_v54  ;;  %2521 = vmatprep.subr.bf16.mxu1 %v5029_v56  ;;  %v5080_v54 = vld [vmem:[#allocation6 + $0x88c] ss:$52 sps:$4 sm:$0xff]   ;;  %v5083_v55 = vld [vmem:[#allocation6 + $0x894] ss:$52 sps:$4 sm:$0xff]  }
  0xb5   :  { %v5078_v56 = vld [vmem:[#allocation6 + $0x888] ss:$52 sps:$4 sm:$0xff]  }
  0xb7   :  { %2440 = vmatpush1.bf16.msra.mxu0 %v5024_v57  ;;  %2522 = vmatpush1.bf16.msra.mxu1 %v5027_v59  ;;  %v5081_v57 = vld [vmem:[#allocation6 + $0x890] ss:$52 sps:$4 sm:$0xff]  }
  0xb8   :  { %2441 = vmatprep.subr.bf16.mxu0 %v5032_v58  ;;  %2523 = vmatprep.subr.bf16.mxu1 %v5035_v60  ;;  %v5086_v58 = vld [vmem:[#allocation6 + $0x8f4] ss:$52 sps:$4 sm:$0xff]   ;;  %v5089_v59 = vld [vmem:[#allocation6 + $0x8fc] ss:$52 sps:$4 sm:$0xff]  }
  0xb9   :  { %v5084_v60 = vld [vmem:[#allocation6 + $0x8f0] ss:$52 sps:$4 sm:$0xff]  }
  0xbb   :  { %2442 = vmatpush1.bf16.msra.mxu0 %v5030_v61  ;;  %2524 = vmatpush1.bf16.msra.mxu1 %v5033_v62  ;;  %v5901_v61 = vsub.s32 2, %v5865_v11  ;;  %v5087_v62 = vld [vmem:[#allocation6 + $0x8f8] ss:$52 sps:$4 sm:$0xff]  }
  0xbc   :  { %2443 = vmatprep.subr.bf16.mxu0 %v5038_v63  ;;  %2525 = vmatprep.subr.bf16.mxu1 %v5041_v1  ;;  %v5092_v63 = vld [vmem:[#allocation6 + $0x95c] ss:$52 sps:$4 sm:$0xff]   ;;  %v5095_v1 = vld [vmem:[#allocation6 + $0x964] ss:$52 sps:$4 sm:$0xff]  }
  0xbf   :  { %2444 = vmatpush1.bf16.msra.mxu0 %v5036_v2  ;;  %2526 = vmatpush1.bf16.msra.mxu1 %v5039_v3  ;;  %v5090_v2 = vld [vmem:[#allocation6 + $0x958] ss:$52 sps:$4 sm:$0xff]   ;;  %v5093_v3 = vld [vmem:[#allocation6 + $0x960] ss:$52 sps:$4 sm:$0xff]  }
  0xc0   :  { %2445 = vmatprep.subr.bf16.mxu0 %v5044_v4  ;;  %2527 = vmatprep.subr.bf16.mxu1 %v5047_v5  ;;  %v139_v4 = vrot.slane %v5867_v12, %v5901_v61  ;;  %v5098_v5 = vld [vmem:[#allocation6 + $0x9c4] ss:$52 sps:$4 sm:$0xff]  }
  0xc3   :  { %2446 = vmatpush1.bf16.msra.mxu0 %v5042_v6  ;;  %2528 = vmatpush1.bf16.msra.mxu1 %v5045_v7  ;;  %v5101_v6 = vld [vmem:[#allocation6 + $0x9cc] ss:$52 sps:$4 sm:$0xff]  }
  0xc4   :  { %2456 = vmatprep.subr.bf16.mxu0 %v5050_v8  ;;  %2538 = vmatprep.subr.bf16.mxu1 %v5053_v9  ;;  %v612_v7 = vld [vmem:[#allocation6 + $0xa28] sm:$0xff]  ;;  %v5096_v9 = vld [vmem:[#allocation6 + $0x9c0] ss:$52 sps:$4 sm:$0xff]  }
 0x159   :  { %v206_v18 = vpop.f32.mrb[0].mxu0  ;;  %v5884_v24 = vpop.f32.mrb[0].mxu1 }
 0x15a   :  { %v207_v20 = vadd.f32 %v206_v18, %v131_v16  ;;  %v208_v21 = vpop.f32.mrb[1].mxu0  ;;  %v249_v27 = vpop.f32.mrb[1].mxu1  ;;  %v248_v8 = vadd.f32 %v5884_v24, %v139_v4  ;;  %v613_v16 = vld [vmem:[#allocation6 + $0xa30] sm:$0xff] }
 0x15b   :  { %v209_v22 = vadd.f32 %v208_v21, %v135_v17  ;;  %v210_v23 = vpop.f32.mrb[2].mxu0  ;;  %v250_v30 = vadd.f32 %v249_v27, %v143_v19  ;;  %v251_v31 = vpop.f32.mrb[2].mxu1  ;;  %v4558_v17 = vcombine.high %v612_v7, %v612_v7  ;;  %v4560_v18 = vcombine.high %v613_v16, %v613_v16  ;;  %v5111_v24 = vld [vmem:[#allocation6 + $0x1c] ss:$52 sps:$4 sm:$0xff]   ;;  %v5109_v27 = vld [vmem:[#allocation6 + $0x18] ss:$52 sps:$4 sm:$0xff]  }
 0x15c   :  { %v254_v25 = vmax.f32 %v207_v20, 0.0  ;;  %v211_v26 = vpop.f32.mrb[3].mxu0  ;;  %v252_v33 = vpop.f32.mrb[3].mxu1  ;;  %v4557_v19 = vcombine.low %v612_v7, %v612_v7  ;;  %v4559_v12 = vcombine.low %v613_v16, %v613_v16  ;;  %v256_v20 = vmax.f32 %v248_v8, 0.0  ;;  %v5108_v23 = vld [vmem:[#allocation6 + $0x14] ss:$52 sps:$4 sm:$0xff]  }
 0x15d   :  { %v255_v28 = vmax.f32 %v209_v22, 0.0  ;;  %v257_v35 = vmax.f32 %v250_v30, 0.0  ;;  %v5117_v30 = vld [vmem:[#allocation6 + $0x84] ss:$52 sps:$4 sm:$0xff]   ;;  %v5115_v31 = vld [vmem:[#allocation6 + $0x80] ss:$52 sps:$4 sm:$0xff]  }
 0x15e   :  { %v5888_v36 = vpack.c.bf16 %v254_v25, %v254_v25  ;;  %v2377_v21 = vsel %vm2375_vm2, %v4557_v19, 0  ;;  %v2383_v22 = vsel %vm2375_vm2, %v4559_v12, 0  ;;  %v5106_v25 = vld [vmem:[#allocation6 + $0x10] ss:$52 sps:$4 sm:$0xff]   ;;  %v5910_v26 = vpack.c.bf16 %v256_v20, %v256_v20  ;;  %v5118_v33 = vld [vmem:[#allocation6 + $0xe0] ss:$52 sps:$4 sm:$0xff]  }
 0x15f   :  { %v5886_v34 = vpack.c.bf16 %v255_v28, %v255_v28  ;;  %v5892_v41 = vpack.c.bf16 %v257_v35, %v257_v35  ;;  %v5114_v28 = vld [vmem:[#allocation6 + $0x7c] ss:$52 sps:$4 sm:$0xff]   ;;  %v5123_v35 = vld [vmem:[#allocation6 + $0xec] ss:$52 sps:$4 sm:$0xff]  }
 0x160   :  { %v5163_v4 = vld [vmem:[#allocation6 + $0x3c0] ss:$52 sps:$4 sm:$0xff]   ;;  %v5169_v8 = vld [vmem:[#allocation6 + $0x428] ss:$52 sps:$4 sm:$0xff]   ;;  %v5178_v12 = vld [vmem:[#allocation6 + $0x4f0] ss:$52 sps:$4 sm:$0xff]  }
 0x161   :  { %2447 = vmatprep.mubr.bf16.mxu0 %v5886_v34  ;;  %2529 = vmatprep.mubr.bf16.mxu1 %v5886_v34  ;;  %v5166_v7 = vld [vmem:[#allocation6 + $0x420] ss:$52 sps:$4 sm:$0xff]   ;;  %v5172_v16 = vld [vmem:[#allocation6 + $0x488] ss:$52 sps:$4 sm:$0xff]   ;;  %v5181_v20 = vld [vmem:[#allocation6 + $0x4f8] ss:$52 sps:$4 sm:$0xff]  }
 0x162   :  { %2448 = vmatmul.mubr.bf16.vlgmr.msra.gmra.mrb[4].mxu0 %v5888_v36  ;;  %2530 = vmatmul.mubr.bf16.vlgmr.msra.gmra.mrb[4].mxu1 %v5888_v36  ;;  %v5183_v19 = vld [vmem:[#allocation6 + $0x4fc] ss:$52 sps:$4 sm:$0xff]  }
 0x163   :  { %2457 = vmatpush1.bf16.msra.mxu0 %v5048_v29  ;;  %2539 = vmatpush1.bf16.msra.mxu1 %v5051_v32  ;;  %v5112_v29 = vld [vmem:[#allocation6 + $0x78] ss:$52 sps:$4 sm:$0xff]  }
 0x164   :  { %2458 = vmatprep.subr.bf16.mxu0 %v5056_v37  ;;  %2540 = vmatprep.subr.bf16.mxu1 %v5059_v38  ;;  %v5120_v32 = vld [vmem:[#allocation6 + $0xe4] ss:$52 sps:$4 sm:$0xff]   ;;  %v5121_v37 = vld [vmem:[#allocation6 + $0xe8] ss:$52 sps:$4 sm:$0xff]   ;;  %v5126_v38 = vld [vmem:[#allocation6 + $0x14c] ss:$52 sps:$4 sm:$0xff]  }
 0x165   :  { %4571 = vmatprep.mubr.msk.bf16.mxu0 %vm2371_vm1, %v5892_v41  ;;  %4573 = vmatprep.mubr.msk.bf16.mxu1 %vm2371_vm1, %v5892_v41 }
 0x167   :  { %2459 = vmatpush1.bf16.msra.mxu0 %v5054_v39  ;;  %2541 = vmatpush1.bf16.msra.mxu1 %v5057_v40  ;;  %v5129_v39 = vld [vmem:[#allocation6 + $0x154] ss:$52 sps:$4 sm:$0xff]  }
 0x168   :  { %2460 = vmatprep.subr.bf16.mxu0 %v5062_v42  ;;  %2542 = vmatprep.subr.bf16.mxu1 %v5065_v43  ;;  %v5124_v40 = vld [vmem:[#allocation6 + $0x148] ss:$52 sps:$4 sm:$0xff]   ;;  %v5127_v42 = vld [vmem:[#allocation6 + $0x150] ss:$52 sps:$4 sm:$0xff]  }
 0x169   :  { %v5132_v43 = vld [vmem:[#allocation6 + $0x1b4] ss:$52 sps:$4 sm:$0xff]  }
 0x16b   :  { %2461 = vmatpush1.bf16.msra.mxu0 %v5060_v44  ;;  %2543 = vmatpush1.bf16.msra.mxu1 %v5063_v45  ;;  %v5135_v44 = vld [vmem:[#allocation6 + $0x1bc] ss:$52 sps:$4 sm:$0xff]  }
 0x16c   :  { %2462 = vmatprep.subr.bf16.mxu0 %v5068_v46  ;;  %2544 = vmatprep.subr.bf16.mxu1 %v5071_v47  ;;  %v5130_v45 = vld [vmem:[#allocation6 + $0x1b0] ss:$52 sps:$4 sm:$0xff]   ;;  %v5133_v46 = vld [vmem:[#allocation6 + $0x1b8] ss:$52 sps:$4 sm:$0xff]  }
 0x16d   :  { %v5138_v47 = vld [vmem:[#allocation6 + $0x21c] ss:$52 sps:$4 sm:$0xff]  }
 0x16f   :  { %2463 = vmatpush1.bf16.msra.mxu0 %v5066_v48  ;;  %2545 = vmatpush1.bf16.msra.mxu1 %v5069_v49  ;;  %v5141_v48 = vld [vmem:[#allocation6 + $0x224] ss:$52 sps:$4 sm:$0xff]  }
 0x170   :  { %2464 = vmatprep.subr.bf16.mxu0 %v5074_v50  ;;  %2546 = vmatprep.subr.bf16.mxu1 %v5077_v51  ;;  %v5136_v49 = vld [vmem:[#allocation6 + $0x218] ss:$52 sps:$4 sm:$0xff]   ;;  %v5139_v50 = vld [vmem:[#allocation6 + $0x220] ss:$52 sps:$4 sm:$0xff]  }
 0x171   :  { %v5144_v51 = vld [vmem:[#allocation6 + $0x284] ss:$52 sps:$4 sm:$0xff]  }
 0x173   :  { %2465 = vmatpush1.bf16.msra.mxu0 %v5072_v52  ;;  %2547 = vmatpush1.bf16.msra.mxu1 %v5075_v53  ;;  %v5147_v52 = vld [vmem:[#allocation6 + $0x28c] ss:$52 sps:$4 sm:$0xff]  }
 0x174   :  { %2466 = vmatprep.subr.bf16.mxu0 %v5080_v54  ;;  %2548 = vmatprep.subr.bf16.mxu1 %v5083_v55  ;;  %v5142_v53 = vld [vmem:[#allocation6 + $0x280] ss:$52 sps:$4 sm:$0xff]   ;;  %v5145_v54 = vld [vmem:[#allocation6 + $0x288] ss:$52 sps:$4 sm:$0xff]  }
 0x175   :  { %v5150_v55 = vld [vmem:[#allocation6 + $0x2ec] ss:$52 sps:$4 sm:$0xff]  }
 0x177   :  { %2467 = vmatpush1.bf16.msra.mxu0 %v5078_v56  ;;  %2549 = vmatpush1.bf16.msra.mxu1 %v5081_v57  ;;  %v5153_v56 = vld [vmem:[#allocation6 + $0x2f4] ss:$52 sps:$4 sm:$0xff]  }
 0x178   :  { %2468 = vmatprep.subr.bf16.mxu0 %v5086_v58  ;;  %2550 = vmatprep.subr.bf16.mxu1 %v5089_v59  ;;  %v5148_v57 = vld [vmem:[#allocation6 + $0x2e8] ss:$52 sps:$4 sm:$0xff]   ;;  %v5151_v58 = vld [vmem:[#allocation6 + $0x2f0] ss:$52 sps:$4 sm:$0xff]  }
 0x179   :  { %v5156_v59 = vld [vmem:[#allocation6 + $0x354] ss:$52 sps:$4 sm:$0xff]  }
 0x17b   :  { %2469 = vmatpush1.bf16.msra.mxu0 %v5084_v60  ;;  %2551 = vmatpush1.bf16.msra.mxu1 %v5087_v62  ;;  %v5159_v60 = vld [vmem:[#allocation6 + $0x35c] ss:$52 sps:$4 sm:$0xff]  }
 0x17c   :  { %2470 = vmatprep.subr.bf16.mxu0 %v5092_v63  ;;  %2552 = vmatprep.subr.bf16.mxu1 %v5095_v1  ;;  %v5154_v62 = vld [vmem:[#allocation6 + $0x350] ss:$52 sps:$4 sm:$0xff]   ;;  %v5157_v63 = vld [vmem:[#allocation6 + $0x358] ss:$52 sps:$4 sm:$0xff]  }
 0x17d   :  { %v5162_v1 = vld [vmem:[#allocation6 + $0x3bc] ss:$52 sps:$4 sm:$0xff]  }
 0x17f   :  { %2471 = vmatpush1.bf16.msra.mxu0 %v5090_v2  ;;  %2553 = vmatpush1.bf16.msra.mxu1 %v5093_v3  ;;  %v5165_v2 = vld [vmem:[#allocation6 + $0x3c4] ss:$52 sps:$4 sm:$0xff]  }
 0x180   :  { %2472 = vmatprep.subr.bf16.mxu0 %v5098_v5  ;;  %2554 = vmatprep.subr.bf16.mxu1 %v5101_v6  ;;  %v5160_v3 = vld [vmem:[#allocation6 + $0x3b8] ss:$52 sps:$4 sm:$0xff]  }
 0x181   :  { %v5168_v5 = vld [vmem:[#allocation6 + $0x424] ss:$52 sps:$4 sm:$0xff]   ;;  %v5171_v6 = vld [vmem:[#allocation6 + $0x42c] ss:$52 sps:$4 sm:$0xff]  }
 0x183   :  { %2473 = vmatpush1.bf16.msra.mxu0 %v5096_v9  ;;  %2555 = vmatpush1.bf16.msra.mxu1 %v5099_v10  ;;  %v5174_v9 = vld [vmem:[#allocation6 + $0x48c] ss:$52 sps:$4 sm:$0xff]   ;;  %v5177_v10 = vld [vmem:[#allocation6 + $0x494] ss:$52 sps:$4 sm:$0xff]  }
 0x184   :  { %4570 = vmatprep.subr.msk.bf16.mxu0 %vm2375_vm2, %v4558_v17  ;;  %4572 = vmatprep.subr.msk.bf16.mxu1 %vm2375_vm2, %v4560_v18  ;;  %v5175_v17 = vld [vmem:[#allocation6 + $0x490] ss:$52 sps:$4 sm:$0xff]   ;;  %v5180_v18 = vld [vmem:[#allocation6 + $0x4f4] ss:$52 sps:$4 sm:$0xff]  }
 0x187   :  { %2475 = vmatpush1.bf16.msra.mxu0 %v2377_v21  ;;  %2557 = vmatpush1.bf16.msra.mxu1 %v2383_v22  ;;  %v5186_v21 = vld [vmem:[#allocation6 + $0x55c] ss:$52 sps:$4 sm:$0xff]   ;;  %v5189_v22 = vld [vmem:[#allocation6 + $0x564] ss:$52 sps:$4 sm:$0xff]  }
 0x188   :  { %2579 = vmatprep.subr.bf16.mxu0 %v5108_v23  ;;  %2661 = vmatprep.subr.bf16.mxu1 %v5111_v24  ;;  %v5184_v23 = vld [vmem:[#allocation6 + $0x558] ss:$52 sps:$4 sm:$0xff]   ;;  %v5187_v24 = vld [vmem:[#allocation6 + $0x560] ss:$52 sps:$4 sm:$0xff]  }
 0x18a   :  { %2489 = vmatmul.mubr.bf16.vlgmr.msra.gmra.mrb[4].mxu0 %v5910_v26  ;;  %2571 = vmatmul.mubr.bf16.vlgmr.msra.gmra.mrb[4].mxu1 %v5910_v26 }
 0x18b   :  { %2580 = vmatpush1.bf16.msra.mxu0 %v5106_v25  ;;  %2611 = vmatprep.mubr.bf16.mxu0 %v5886_v34  ;;  %v5192_v25 = vld [vmem:[#allocation6 + $0x5c4] ss:$52 sps:$4 sm:$0xff]  }
 0x18c   :  { %2662 = vmatpush1.bf16.msra.mxu1 %v5109_v27  ;;  %2693 = vmatprep.mubr.bf16.mxu1 %v5886_v34  ;;  %v5195_v27 = vld [vmem:[#allocation6 + $0x5cc] ss:$52 sps:$4 sm:$0xff]  }
 0x18d   :  { %2581 = vmatprep.subr.bf16.mxu0 %v5114_v28  ;;  %2663 = vmatprep.subr.bf16.mxu1 %v5117_v30  ;;  %v5190_v28 = vld [vmem:[#allocation6 + $0x5c0] ss:$52 sps:$4 sm:$0xff]  }
 0x18e   :  { %v5198_v30 = vld [vmem:[#allocation6 + $0x62c] ss:$52 sps:$4 sm:$0xff]  }
 0x18f   :  { %2582 = vmatpush1.bf16.msra.mxu0 %v5112_v29  ;;  %v5193_v29 = vld [vmem:[#allocation6 + $0x5c8] ss:$52 sps:$4 sm:$0xff]  }
 0x190   :  { %2664 = vmatpush1.bf16.msra.mxu1 %v5115_v31  ;;  %2583 = vmatprep.subr.bf16.mxu0 %v5120_v32  ;;  %v5201_v31 = vld [vmem:[#allocation6 + $0x634] ss:$52 sps:$4 sm:$0xff]  }
 0x191   :  { %2665 = vmatprep.subr.bf16.mxu1 %v5123_v35  ;;  %v5196_v32 = vld [vmem:[#allocation6 + $0x628] ss:$52 sps:$4 sm:$0xff]  }
 0x192   :  { %v5204_v35 = vld [vmem:[#allocation6 + $0x694] ss:$52 sps:$4 sm:$0xff]  }
 0x193   :  { %2584 = vmatpush1.bf16.msra.mxu0 %v5118_v33  ;;  %v5199_v33 = vld [vmem:[#allocation6 + $0x630] ss:$52 sps:$4 sm:$0xff]  }
 0x194   :  { %2666 = vmatpush1.bf16.msra.mxu1 %v5121_v37  ;;  %2585 = vmatprep.subr.bf16.mxu0 %v5126_v38  ;;  %v5207_v37 = vld [vmem:[#allocation6 + $0x69c] ss:$52 sps:$4 sm:$0xff]  }
 0x195   :  { %2667 = vmatprep.subr.bf16.mxu1 %v5129_v39  ;;  %v5202_v38 = vld [vmem:[#allocation6 + $0x690] ss:$52 sps:$4 sm:$0xff]   ;;  %v5205_v39 = vld [vmem:[#allocation6 + $0x698] ss:$52 sps:$4 sm:$0xff]  }
 0x197   :  { %2586 = vmatpush1.bf16.msra.mxu0 %v5124_v40  ;;  %v5210_v40 = vld [vmem:[#allocation6 + $0x6fc] ss:$52 sps:$4 sm:$0xff]  }
 0x198   :  { %2668 = vmatpush1.bf16.msra.mxu1 %v5127_v42  ;;  %2587 = vmatprep.subr.bf16.mxu0 %v5132_v43  ;;  %v5213_v42 = vld [vmem:[#allocation6 + $0x704] ss:$52 sps:$4 sm:$0xff]  }
 0x199   :  { %2669 = vmatprep.subr.bf16.mxu1 %v5135_v44  ;;  %v5208_v43 = vld [vmem:[#allocation6 + $0x6f8] ss:$52 sps:$4 sm:$0xff]   ;;  %v5211_v44 = vld [vmem:[#allocation6 + $0x700] ss:$52 sps:$4 sm:$0xff]  }
 0x19b   :  { %2588 = vmatpush1.bf16.msra.mxu0 %v5130_v45  ;;  %v5216_v45 = vld [vmem:[#allocation6 + $0x764] ss:$52 sps:$4 sm:$0xff]  }
 0x19c   :  { %2670 = vmatpush1.bf16.msra.mxu1 %v5133_v46  ;;  %2589 = vmatprep.subr.bf16.mxu0 %v5138_v47  ;;  %v5219_v46 = vld [vmem:[#allocation6 + $0x76c] ss:$52 sps:$4 sm:$0xff]  }
 0x19d   :  { %2671 = vmatprep.subr.bf16.mxu1 %v5141_v48  ;;  %v5214_v47 = vld [vmem:[#allocation6 + $0x760] ss:$52 sps:$4 sm:$0xff]   ;;  %v5217_v48 = vld [vmem:[#allocation6 + $0x768] ss:$52 sps:$4 sm:$0xff]  }
 0x19f   :  { %2590 = vmatpush1.bf16.msra.mxu0 %v5136_v49  ;;  %v5222_v49 = vld [vmem:[#allocation6 + $0x7cc] ss:$52 sps:$4 sm:$0xff]  }
 0x1a0   :  { %2672 = vmatpush1.bf16.msra.mxu1 %v5139_v50  ;;  %2591 = vmatprep.subr.bf16.mxu0 %v5144_v51  ;;  %v5225_v50 = vld [vmem:[#allocation6 + $0x7d4] ss:$52 sps:$4 sm:$0xff]  }
 0x1a1   :  { %2673 = vmatprep.subr.bf16.mxu1 %v5147_v52  ;;  %v5220_v51 = vld [vmem:[#allocation6 + $0x7c8] ss:$52 sps:$4 sm:$0xff]   ;;  %v5223_v52 = vld [vmem:[#allocation6 + $0x7d0] ss:$52 sps:$4 sm:$0xff]  }
 0x1a3   :  { %2592 = vmatpush1.bf16.msra.mxu0 %v5142_v53  ;;  %v5228_v53 = vld [vmem:[#allocation6 + $0x834] ss:$52 sps:$4 sm:$0xff]  }
 0x1a4   :  { %2674 = vmatpush1.bf16.msra.mxu1 %v5145_v54  ;;  %2593 = vmatprep.subr.bf16.mxu0 %v5150_v55  ;;  %v5231_v54 = vld [vmem:[#allocation6 + $0x83c] ss:$52 sps:$4 sm:$0xff]  }
 0x1a5   :  { %2675 = vmatprep.subr.bf16.mxu1 %v5153_v56  ;;  %v5226_v55 = vld [vmem:[#allocation6 + $0x830] ss:$52 sps:$4 sm:$0xff]   ;;  %v5229_v56 = vld [vmem:[#allocation6 + $0x838] ss:$52 sps:$4 sm:$0xff]  }
 0x1a7   :  { %2594 = vmatpush1.bf16.msra.mxu0 %v5148_v57  ;;  %v5234_v57 = vld [vmem:[#allocation6 + $0x89c] ss:$52 sps:$4 sm:$0xff]  }
 0x1a8   :  { %2676 = vmatpush1.bf16.msra.mxu1 %v5151_v58  ;;  %2595 = vmatprep.subr.bf16.mxu0 %v5156_v59  ;;  %v5237_v58 = vld [vmem:[#allocation6 + $0x8a4] ss:$52 sps:$4 sm:$0xff]  }
 0x1a9   :  { %2677 = vmatprep.subr.bf16.mxu1 %v5159_v60  ;;  %v5232_v59 = vld [vmem:[#allocation6 + $0x898] ss:$52 sps:$4 sm:$0xff]   ;;  %v5235_v60 = vld [vmem:[#allocation6 + $0x8a0] ss:$52 sps:$4 sm:$0xff]  }
 0x1ab   :  { %2596 = vmatpush1.bf16.msra.mxu0 %v5154_v62  ;;  %v5240_v62 = vld [vmem:[#allocation6 + $0x904] ss:$52 sps:$4 sm:$0xff]  }
 0x1ac   :  { %2678 = vmatpush1.bf16.msra.mxu1 %v5157_v63  ;;  %2597 = vmatprep.subr.bf16.mxu0 %v5162_v1  ;;  %v5243_v63 = vld [vmem:[#allocation6 + $0x90c] ss:$52 sps:$4 sm:$0xff]  }
 0x1ad   :  { %2679 = vmatprep.subr.bf16.mxu1 %v5165_v2  ;;  %v5238_v1 = vld [vmem:[#allocation6 + $0x900] ss:$52 sps:$4 sm:$0xff]   ;;  %v5241_v2 = vld [vmem:[#allocation6 + $0x908] ss:$52 sps:$4 sm:$0xff]  }
 0x1af   :  { %2598 = vmatpush1.bf16.msra.mxu0 %v5160_v3  ;;  %v5246_v3 = vld [vmem:[#allocation6 + $0x96c] ss:$52 sps:$4 sm:$0xff]  }
 0x1b0   :  { %2680 = vmatpush1.bf16.msra.mxu1 %v5163_v4  ;;  %2599 = vmatprep.subr.bf16.mxu0 %v5168_v5  ;;  %v5249_v4 = vld [vmem:[#allocation6 + $0x974] ss:$52 sps:$4 sm:$0xff]  }
 0x1b1   :  { %2681 = vmatprep.subr.bf16.mxu1 %v5171_v6  ;;  %v5244_v5 = vld [vmem:[#allocation6 + $0x968] ss:$52 sps:$4 sm:$0xff]   ;;  %v5247_v6 = vld [vmem:[#allocation6 + $0x970] ss:$52 sps:$4 sm:$0xff]  }
 0x1b3   :  { %2600 = vmatpush1.bf16.msra.mxu0 %v5166_v7  ;;  %v5252_v7 = vld [vmem:[#allocation6 + $0x9d4] ss:$52 sps:$4 sm:$0xff]  }
 0x1b4   :  { %2682 = vmatpush1.bf16.msra.mxu1 %v5169_v8  ;;  %2601 = vmatprep.subr.bf16.mxu0 %v5174_v9  ;;  %v5255_v8 = vld [vmem:[#allocation6 + $0x9dc] ss:$52 sps:$4 sm:$0xff]  }
 0x1b5   :  { %2683 = vmatprep.subr.bf16.mxu1 %v5177_v10  ;;  %v614_v9 = vld [vmem:[#allocation6 + $0xa38] sm:$0xff]  ;;  %v615_v10 = vld [vmem:[#allocation6 + $0xa40] sm:$0xff] }
 0x1b7   :  { %2602 = vmatpush1.bf16.msra.mxu0 %v5172_v16  ;;  %v5250_v16 = vld [vmem:[#allocation6 + $0x9d0] ss:$52 sps:$4 sm:$0xff]  }
 0x1b8   :  { %2684 = vmatpush1.bf16.msra.mxu1 %v5175_v17  ;;  %2603 = vmatprep.subr.bf16.mxu0 %v5180_v18  ;;  %v5253_v17 = vld [vmem:[#allocation6 + $0x9d8] ss:$52 sps:$4 sm:$0xff]   ;;  %v4562_v18 = vcombine.high %v614_v9, %v614_v9 }
 0x1b9   :  { %2685 = vmatprep.subr.bf16.mxu1 %v5183_v19  ;;  %v4561_v19 = vcombine.low %v614_v9, %v614_v9  ;;  %v5328_v9 = vld [vmem:[#allocation6 + $0x49c] ss:$52 sps:$4 sm:$0xff]  }
 0x1bb   :  { %2604 = vmatpush1.bf16.msra.mxu0 %v5178_v12  ;;  %v4564_v12 = vcombine.high %v615_v10, %v615_v10 }
 0x1bc   :  { %2686 = vmatpush1.bf16.msra.mxu1 %v5181_v20  ;;  %2605 = vmatprep.subr.bf16.mxu0 %v5186_v21  ;;  %v4563_v20 = vcombine.low %v615_v10, %v615_v10  ;;  %v2389_v21 = vsel %vm2375_vm2, %v4561_v19, 0  ;;  %v5331_v10 = vld [vmem:[#allocation6 + $0x4a4] ss:$52 sps:$4 sm:$0xff]   ;;  %v5337_v19 = vld [vmem:[#allocation6 + $0x50c] ss:$52 sps:$4 sm:$0xff]  }
 0x1bd   :  { %2687 = vmatprep.subr.bf16.mxu1 %v5189_v22  ;;  %v5262_v22 = vld [vmem:[#allocation6 + $0x24] ss:$52 sps:$4 sm:$0xff]  }
 0x1bf   :  { %2606 = vmatpush1.bf16.msra.mxu0 %v5184_v23  ;;  %v2395_v23 = vsel %vm2375_vm2, %v4563_v20, 0  ;;  %v5335_v20 = vld [vmem:[#allocation6 + $0x508] ss:$52 sps:$4 sm:$0xff]  }
 0x1c0   :  { %2688 = vmatpush1.bf16.msra.mxu1 %v5187_v24  ;;  %2607 = vmatprep.subr.bf16.mxu0 %v5192_v25  ;;  %v5265_v24 = vld [vmem:[#allocation6 + $0x2c] ss:$52 sps:$4 sm:$0xff]  }
 0x1c1   :  { %2689 = vmatprep.subr.bf16.mxu1 %v5195_v27  ;;  %v5260_v25 = vld [vmem:[#allocation6 + $0x20] ss:$52 sps:$4 sm:$0xff]   ;;  %v5263_v27 = vld [vmem:[#allocation6 + $0x28] ss:$52 sps:$4 sm:$0xff]  }
 0x1c3   :  { %2608 = vmatpush1.bf16.msra.mxu0 %v5190_v28  ;;  %v5268_v28 = vld [vmem:[#allocation6 + $0x8c] ss:$52 sps:$4 sm:$0xff]  }
 0x1c4   :  { %2690 = vmatpush1.bf16.msra.mxu1 %v5193_v29  ;;  %2609 = vmatprep.subr.bf16.mxu0 %v5198_v30  ;;  %v5271_v29 = vld [vmem:[#allocation6 + $0x94] ss:$52 sps:$4 sm:$0xff]  }
 0x1c5   :  { %2691 = vmatprep.subr.bf16.mxu1 %v5201_v31  ;;  %v5266_v30 = vld [vmem:[#allocation6 + $0x88] ss:$52 sps:$4 sm:$0xff]   ;;  %v5269_v31 = vld [vmem:[#allocation6 + $0x90] ss:$52 sps:$4 sm:$0xff]  }
 0x1c7   :  { %2610 = vmatpush1.bf16.msra.mxu0 %v5196_v32  ;;  %v5274_v32 = vld [vmem:[#allocation6 + $0xf4] ss:$52 sps:$4 sm:$0xff]  }
 0x1c8   :  { %2692 = vmatpush1.bf16.msra.mxu1 %v5199_v33  ;;  %2620 = vmatprep.subr.bf16.mxu0 %v5204_v35  ;;  %v5277_v33 = vld [vmem:[#allocation6 + $0xfc] ss:$52 sps:$4 sm:$0xff]  }
 0x1c9   :  { %2702 = vmatprep.subr.bf16.mxu1 %v5207_v37  ;;  %v5272_v35 = vld [vmem:[#allocation6 + $0xf0] ss:$52 sps:$4 sm:$0xff]   ;;  %v5275_v37 = vld [vmem:[#allocation6 + $0xf8] ss:$52 sps:$4 sm:$0xff]  }
 0x1ca   :  { %2612 = vmatmul.mubr.bf16.vlgmr.msra.gmra.mrb[8].mxu0 %v5888_v36 }
 0x1cb   :  { %2694 = vmatmul.mubr.bf16.vlgmr.msra.gmra.mrb[8].mxu1 %v5888_v36  ;;  %2621 = vmatpush1.bf16.msra.mxu0 %v5202_v38  ;;  %v5280_v38 = vld [vmem:[#allocation6 + $0x15c] ss:$52 sps:$4 sm:$0xff]  }
 0x1cc   :  { %4575 = vmatprep.mubr.msk.bf16.mxu0 %vm2371_vm1, %v5892_v41  ;;  %2703 = vmatpush1.bf16.msra.mxu1 %v5205_v39  ;;  %v5283_v39 = vld [vmem:[#allocation6 + $0x164] ss:$52 sps:$4 sm:$0xff]  }
 0x1cd   :  { %4577 = vmatprep.mubr.msk.bf16.mxu1 %vm2371_vm1, %v5892_v41  ;;  %2622 = vmatprep.subr.bf16.mxu0 %v5210_v40  ;;  %v5278_v40 = vld [vmem:[#allocation6 + $0x158] ss:$52 sps:$4 sm:$0xff]  }
 0x1ce   :  { %2704 = vmatprep.subr.bf16.mxu1 %v5213_v42  ;;  %v5281_v42 = vld [vmem:[#allocation6 + $0x160] ss:$52 sps:$4 sm:$0xff]  }
 0x1cf   :  { %2623 = vmatpush1.bf16.msra.mxu0 %v5208_v43  ;;  %v5286_v43 = vld [vmem:[#allocation6 + $0x1c4] ss:$52 sps:$4 sm:$0xff]  }
 0x1d0   :  { %2705 = vmatpush1.bf16.msra.mxu1 %v5211_v44  ;;  %2624 = vmatprep.subr.bf16.mxu0 %v5216_v45  ;;  %v5289_v44 = vld [vmem:[#allocation6 + $0x1cc] ss:$52 sps:$4 sm:$0xff]  }
 0x1d1   :  { %2706 = vmatprep.subr.bf16.mxu1 %v5219_v46  ;;  %v5284_v45 = vld [vmem:[#allocation6 + $0x1c0] ss:$52 sps:$4 sm:$0xff]   ;;  %v5287_v46 = vld [vmem:[#allocation6 + $0x1c8] ss:$52 sps:$4 sm:$0xff]  }
 0x1d3   :  { %2625 = vmatpush1.bf16.msra.mxu0 %v5214_v47  ;;  %v5292_v47 = vld [vmem:[#allocation6 + $0x22c] ss:$52 sps:$4 sm:$0xff]  }
 0x1d4   :  { %2707 = vmatpush1.bf16.msra.mxu1 %v5217_v48  ;;  %2626 = vmatprep.subr.bf16.mxu0 %v5222_v49  ;;  %v5295_v48 = vld [vmem:[#allocation6 + $0x234] ss:$52 sps:$4 sm:$0xff]  }
 0x1d5   :  { %2708 = vmatprep.subr.bf16.mxu1 %v5225_v50  ;;  %v5290_v49 = vld [vmem:[#allocation6 + $0x228] ss:$52 sps:$4 sm:$0xff]   ;;  %v5293_v50 = vld [vmem:[#allocation6 + $0x230] ss:$52 sps:$4 sm:$0xff]  }
 0x1d7   :  { %2627 = vmatpush1.bf16.msra.mxu0 %v5220_v51  ;;  %v5298_v51 = vld [vmem:[#allocation6 + $0x294] ss:$52 sps:$4 sm:$0xff]  }
 0x1d8   :  { %2709 = vmatpush1.bf16.msra.mxu1 %v5223_v52  ;;  %2628 = vmatprep.subr.bf16.mxu0 %v5228_v53  ;;  %v5301_v52 = vld [vmem:[#allocation6 + $0x29c] ss:$52 sps:$4 sm:$0xff]  }
 0x1d9   :  { %2710 = vmatprep.subr.bf16.mxu1 %v5231_v54  ;;  %v5296_v53 = vld [vmem:[#allocation6 + $0x290] ss:$52 sps:$4 sm:$0xff]   ;;  %v5299_v54 = vld [vmem:[#allocation6 + $0x298] ss:$52 sps:$4 sm:$0xff]  }
 0x1db   :  { %2629 = vmatpush1.bf16.msra.mxu0 %v5226_v55  ;;  %v5304_v55 = vld [vmem:[#allocation6 + $0x2fc] ss:$52 sps:$4 sm:$0xff]  }
 0x1dc   :  { %2711 = vmatpush1.bf16.msra.mxu1 %v5229_v56  ;;  %2630 = vmatprep.subr.bf16.mxu0 %v5234_v57  ;;  %v5307_v56 = vld [vmem:[#allocation6 + $0x304] ss:$52 sps:$4 sm:$0xff]  }
 0x1dd   :  { %2712 = vmatprep.subr.bf16.mxu1 %v5237_v58  ;;  %v5302_v57 = vld [vmem:[#allocation6 + $0x2f8] ss:$52 sps:$4 sm:$0xff]   ;;  %v5305_v58 = vld [vmem:[#allocation6 + $0x300] ss:$52 sps:$4 sm:$0xff]  }
 0x1df   :  { %2631 = vmatpush1.bf16.msra.mxu0 %v5232_v59  ;;  %v5310_v59 = vld [vmem:[#allocation6 + $0x364] ss:$52 sps:$4 sm:$0xff]  }
 0x1e0   :  { %2713 = vmatpush1.bf16.msra.mxu1 %v5235_v60  ;;  %2632 = vmatprep.subr.bf16.mxu0 %v5240_v62  ;;  %v5313_v60 = vld [vmem:[#allocation6 + $0x36c] ss:$52 sps:$4 sm:$0xff]  }
 0x1e1   :  { %2714 = vmatprep.subr.bf16.mxu1 %v5243_v63  ;;  %v5308_v62 = vld [vmem:[#allocation6 + $0x360] ss:$52 sps:$4 sm:$0xff]   ;;  %v5311_v63 = vld [vmem:[#allocation6 + $0x368] ss:$52 sps:$4 sm:$0xff]  }
 0x1e3   :  { %2633 = vmatpush1.bf16.msra.mxu0 %v5238_v1  ;;  %v5316_v1 = vld [vmem:[#allocation6 + $0x3cc] ss:$52 sps:$4 sm:$0xff]  }
 0x1e4   :  { %2715 = vmatpush1.bf16.msra.mxu1 %v5241_v2  ;;  %2634 = vmatprep.subr.bf16.mxu0 %v5246_v3  ;;  %v5319_v2 = vld [vmem:[#allocation6 + $0x3d4] ss:$52 sps:$4 sm:$0xff]  }
 0x1e5   :  { %2716 = vmatprep.subr.bf16.mxu1 %v5249_v4  ;;  %v5314_v3 = vld [vmem:[#allocation6 + $0x3c8] ss:$52 sps:$4 sm:$0xff]   ;;  %v5317_v4 = vld [vmem:[#allocation6 + $0x3d0] ss:$52 sps:$4 sm:$0xff]  }
 0x1e7   :  { %2635 = vmatpush1.bf16.msra.mxu0 %v5244_v5  ;;  %v5322_v5 = vld [vmem:[#allocation6 + $0x434] ss:$52 sps:$4 sm:$0xff]  }
 0x1e8   :  { %2717 = vmatpush1.bf16.msra.mxu1 %v5247_v6  ;;  %2636 = vmatprep.subr.bf16.mxu0 %v5252_v7  ;;  %v5325_v6 = vld [vmem:[#allocation6 + $0x43c] ss:$52 sps:$4 sm:$0xff]  }
 0x1e9   :  { %2718 = vmatprep.subr.bf16.mxu1 %v5255_v8  ;;  %v5320_v7 = vld [vmem:[#allocation6 + $0x430] ss:$52 sps:$4 sm:$0xff]   ;;  %v5323_v8 = vld [vmem:[#allocation6 + $0x438] ss:$52 sps:$4 sm:$0xff]  }
 0x1eb   :  { %2637 = vmatpush1.bf16.msra.mxu0 %v5250_v16  ;;  %v5326_v16 = vld [vmem:[#allocation6 + $0x498] ss:$52 sps:$4 sm:$0xff]  }
 0x1ec   :  { %2719 = vmatpush1.bf16.msra.mxu1 %v5253_v17  ;;  %4574 = vmatprep.subr.msk.bf16.mxu0 %vm2375_vm2, %v4562_v18  ;;  %v5329_v17 = vld [vmem:[#allocation6 + $0x4a0] ss:$52 sps:$4 sm:$0xff]   ;;  %v5334_v18 = vld [vmem:[#allocation6 + $0x504] ss:$52 sps:$4 sm:$0xff]  }
 0x1ed   :  { %4576 = vmatprep.subr.msk.bf16.mxu1 %vm2375_vm2, %v4564_v12  ;;  %v5332_v12 = vld [vmem:[#allocation6 + $0x500] ss:$52 sps:$4 sm:$0xff]  }
 0x1ef   :  { %2639 = vmatpush1.bf16.msra.mxu0 %v2389_v21  ;;  %v5340_v21 = vld [vmem:[#allocation6 + $0x56c] ss:$52 sps:$4 sm:$0xff]  }
 0x1f0   :  { %2721 = vmatpush1.bf16.msra.mxu1 %v2395_v23  ;;  %2743 = vmatprep.subr.bf16.mxu0 %v5262_v22  ;;  %v5343_v22 = vld [vmem:[#allocation6 + $0x574] ss:$52 sps:$4 sm:$0xff]  }
 0x1f1   :  { %2825 = vmatprep.subr.bf16.mxu1 %v5265_v24  ;;  %v5338_v23 = vld [vmem:[#allocation6 + $0x568] ss:$52 sps:$4 sm:$0xff]   ;;  %v5341_v24 = vld [vmem:[#allocation6 + $0x570] ss:$52 sps:$4 sm:$0xff]  }
 0x1f2   :  { %2653 = vmatmul.mubr.bf16.vlgmr.msra.gmra.mrb[8].mxu0 %v5910_v26 }
 0x1f3   :  { %2735 = vmatmul.mubr.bf16.vlgmr.msra.gmra.mrb[8].mxu1 %v5910_v26  ;;  %2744 = vmatpush1.bf16.msra.mxu0 %v5260_v25  ;;  %v5346_v25 = vld [vmem:[#allocation6 + $0x5d4] ss:$52 sps:$4 sm:$0xff]  }
 0x1f4   :  { %2775 = vmatprep.mubr.bf16.mxu0 %v5886_v34  ;;  %2826 = vmatpush1.bf16.msra.mxu1 %v5263_v27  ;;  %v5349_v27 = vld [vmem:[#allocation6 + $0x5dc] ss:$52 sps:$4 sm:$0xff]  }
 0x1f5   :  { %2857 = vmatprep.mubr.bf16.mxu1 %v5886_v34  ;;  %2745 = vmatprep.subr.bf16.mxu0 %v5268_v28  ;;  %v5344_v28 = vld [vmem:[#allocation6 + $0x5d0] ss:$52 sps:$4 sm:$0xff]  }
 0x1f6   :  { %2827 = vmatprep.subr.bf16.mxu1 %v5271_v29  ;;  %v5347_v29 = vld [vmem:[#allocation6 + $0x5d8] ss:$52 sps:$4 sm:$0xff]  }
 0x1f7   :  { %2746 = vmatpush1.bf16.msra.mxu0 %v5266_v30  ;;  %v5352_v30 = vld [vmem:[#allocation6 + $0x63c] ss:$52 sps:$4 sm:$0xff]  }
 0x1f8   :  { %2828 = vmatpush1.bf16.msra.mxu1 %v5269_v31  ;;  %2747 = vmatprep.subr.bf16.mxu0 %v5274_v32  ;;  %v5355_v31 = vld [vmem:[#allocation6 + $0x644] ss:$52 sps:$4 sm:$0xff]  }
 0x1f9   :  { %2829 = vmatprep.subr.bf16.mxu1 %v5277_v33  ;;  %v5350_v32 = vld [vmem:[#allocation6 + $0x638] ss:$52 sps:$4 sm:$0xff]   ;;  %v5353_v33 = vld [vmem:[#allocation6 + $0x640] ss:$52 sps:$4 sm:$0xff]  }
 0x1fb   :  { %2748 = vmatpush1.bf16.msra.mxu0 %v5272_v35  ;;  %v5358_v35 = vld [vmem:[#allocation6 + $0x6a4] ss:$52 sps:$4 sm:$0xff]  }
 0x1fc   :  { %2830 = vmatpush1.bf16.msra.mxu1 %v5275_v37  ;;  %2749 = vmatprep.subr.bf16.mxu0 %v5280_v38  ;;  %v5361_v37 = vld [vmem:[#allocation6 + $0x6ac] ss:$52 sps:$4 sm:$0xff]  }
 0x1fd   :  { %2831 = vmatprep.subr.bf16.mxu1 %v5283_v39  ;;  %v5356_v38 = vld [vmem:[#allocation6 + $0x6a0] ss:$52 sps:$4 sm:$0xff]   ;;  %v5359_v39 = vld [vmem:[#allocation6 + $0x6a8] ss:$52 sps:$4 sm:$0xff]  }
 0x1ff   :  { %2750 = vmatpush1.bf16.msra.mxu0 %v5278_v40  ;;  %v5364_v40 = vld [vmem:[#allocation6 + $0x70c] ss:$52 sps:$4 sm:$0xff]  }
 0x200   :  { %2832 = vmatpush1.bf16.msra.mxu1 %v5281_v42  ;;  %2751 = vmatprep.subr.bf16.mxu0 %v5286_v43  ;;  %v5367_v42 = vld [vmem:[#allocation6 + $0x714] ss:$52 sps:$4 sm:$0xff]  }
 0x201   :  { %2833 = vmatprep.subr.bf16.mxu1 %v5289_v44  ;;  %v5362_v43 = vld [vmem:[#allocation6 + $0x708] ss:$52 sps:$4 sm:$0xff]   ;;  %v5365_v44 = vld [vmem:[#allocation6 + $0x710] ss:$52 sps:$4 sm:$0xff]  }
 0x203   :  { %2752 = vmatpush1.bf16.msra.mxu0 %v5284_v45  ;;  %v5370_v45 = vld [vmem:[#allocation6 + $0x774] ss:$52 sps:$4 sm:$0xff]  }
 0x204   :  { %2834 = vmatpush1.bf16.msra.mxu1 %v5287_v46  ;;  %2753 = vmatprep.subr.bf16.mxu0 %v5292_v47  ;;  %v5373_v46 = vld [vmem:[#allocation6 + $0x77c] ss:$52 sps:$4 sm:$0xff]  }
 0x205   :  { %2835 = vmatprep.subr.bf16.mxu1 %v5295_v48  ;;  %v5368_v47 = vld [vmem:[#allocation6 + $0x770] ss:$52 sps:$4 sm:$0xff]   ;;  %v5371_v48 = vld [vmem:[#allocation6 + $0x778] ss:$52 sps:$4 sm:$0xff]  }
 0x207   :  { %2754 = vmatpush1.bf16.msra.mxu0 %v5290_v49  ;;  %v5376_v49 = vld [vmem:[#allocation6 + $0x7dc] ss:$52 sps:$4 sm:$0xff]  }
 0x208   :  { %2836 = vmatpush1.bf16.msra.mxu1 %v5293_v50  ;;  %2755 = vmatprep.subr.bf16.mxu0 %v5298_v51  ;;  %v5379_v50 = vld [vmem:[#allocation6 + $0x7e4] ss:$52 sps:$4 sm:$0xff]  }
 0x209   :  { %2837 = vmatprep.subr.bf16.mxu1 %v5301_v52  ;;  %v5374_v51 = vld [vmem:[#allocation6 + $0x7d8] ss:$52 sps:$4 sm:$0xff]   ;;  %v5377_v52 = vld [vmem:[#allocation6 + $0x7e0] ss:$52 sps:$4 sm:$0xff]  }
 0x20b   :  { %2756 = vmatpush1.bf16.msra.mxu0 %v5296_v53  ;;  %v5382_v53 = vld [vmem:[#allocation6 + $0x844] ss:$52 sps:$4 sm:$0xff]  }
 0x20c   :  { %2838 = vmatpush1.bf16.msra.mxu1 %v5299_v54  ;;  %2757 = vmatprep.subr.bf16.mxu0 %v5304_v55  ;;  %v5385_v54 = vld [vmem:[#allocation6 + $0x84c] ss:$52 sps:$4 sm:$0xff]  }
 0x20d   :  { %2839 = vmatprep.subr.bf16.mxu1 %v5307_v56  ;;  %v5380_v55 = vld [vmem:[#allocation6 + $0x840] ss:$52 sps:$4 sm:$0xff]   ;;  %v5383_v56 = vld [vmem:[#allocation6 + $0x848] ss:$52 sps:$4 sm:$0xff]  }
 0x20f   :  { %2758 = vmatpush1.bf16.msra.mxu0 %v5302_v57  ;;  %v5388_v57 = vld [vmem:[#allocation6 + $0x8ac] ss:$52 sps:$4 sm:$0xff]  }
 0x210   :  { %2840 = vmatpush1.bf16.msra.mxu1 %v5305_v58  ;;  %2759 = vmatprep.subr.bf16.mxu0 %v5310_v59  ;;  %v5391_v58 = vld [vmem:[#allocation6 + $0x8b4] ss:$52 sps:$4 sm:$0xff]  }
 0x211   :  { %2841 = vmatprep.subr.bf16.mxu1 %v5313_v60  ;;  %v5386_v59 = vld [vmem:[#allocation6 + $0x8a8] ss:$52 sps:$4 sm:$0xff]   ;;  %v5389_v60 = vld [vmem:[#allocation6 + $0x8b0] ss:$52 sps:$4 sm:$0xff]  }
 0x213   :  { %2760 = vmatpush1.bf16.msra.mxu0 %v5308_v62  ;;  %v5394_v62 = vld [vmem:[#allocation6 + $0x914] ss:$52 sps:$4 sm:$0xff]  }
 0x214   :  { %2842 = vmatpush1.bf16.msra.mxu1 %v5311_v63  ;;  %2761 = vmatprep.subr.bf16.mxu0 %v5316_v1  ;;  %v5397_v63 = vld [vmem:[#allocation6 + $0x91c] ss:$52 sps:$4 sm:$0xff]  }
 0x215   :  { %2843 = vmatprep.subr.bf16.mxu1 %v5319_v2  ;;  %v5392_v1 = vld [vmem:[#allocation6 + $0x910] ss:$52 sps:$4 sm:$0xff]   ;;  %v5395_v2 = vld [vmem:[#allocation6 + $0x918] ss:$52 sps:$4 sm:$0xff]  }
 0x217   :  { %2762 = vmatpush1.bf16.msra.mxu0 %v5314_v3  ;;  %v5400_v3 = vld [vmem:[#allocation6 + $0x97c] ss:$52 sps:$4 sm:$0xff]  }
 0x218   :  { %2844 = vmatpush1.bf16.msra.mxu1 %v5317_v4  ;;  %2763 = vmatprep.subr.bf16.mxu0 %v5322_v5  ;;  %v5403_v4 = vld [vmem:[#allocation6 + $0x984] ss:$52 sps:$4 sm:$0xff]  }
 0x219   :  { %2845 = vmatprep.subr.bf16.mxu1 %v5325_v6  ;;  %v5398_v5 = vld [vmem:[#allocation6 + $0x978] ss:$52 sps:$4 sm:$0xff]   ;;  %v5401_v6 = vld [vmem:[#allocation6 + $0x980] ss:$52 sps:$4 sm:$0xff]  }
 0x21b   :  { %2764 = vmatpush1.bf16.msra.mxu0 %v5320_v7  ;;  %v5406_v7 = vld [vmem:[#allocation6 + $0x9e4] ss:$52 sps:$4 sm:$0xff]  }
 0x21c   :  { %2846 = vmatpush1.bf16.msra.mxu1 %v5323_v8  ;;  %2765 = vmatprep.subr.bf16.mxu0 %v5328_v9  ;;  %v5409_v8 = vld [vmem:[#allocation6 + $0x9ec] ss:$52 sps:$4 sm:$0xff]  }
 0x21d   :  { %2847 = vmatprep.subr.bf16.mxu1 %v5331_v10  ;;  %v616_v9 = vld [vmem:[#allocation6 + $0xa48] sm:$0xff]  ;;  %v617_v10 = vld [vmem:[#allocation6 + $0xa50] sm:$0xff] }
 0x21f   :  { %2766 = vmatpush1.bf16.msra.mxu0 %v5326_v16  ;;  %v5404_v16 = vld [vmem:[#allocation6 + $0x9e0] ss:$52 sps:$4 sm:$0xff]  }
 0x220   :  { %2848 = vmatpush1.bf16.msra.mxu1 %v5329_v17  ;;  %2767 = vmatprep.subr.bf16.mxu0 %v5334_v18  ;;  %v5407_v17 = vld [vmem:[#allocation6 + $0x9e8] ss:$52 sps:$4 sm:$0xff]   ;;  %v4566_v18 = vcombine.high %v616_v9, %v616_v9 }
 0x221   :  { %2849 = vmatprep.subr.bf16.mxu1 %v5337_v19  ;;  %v4565_v19 = vcombine.low %v616_v9, %v616_v9 }
 0x223   :  { %2768 = vmatpush1.bf16.msra.mxu0 %v5332_v12  ;;  %v4568_v12 = vcombine.high %v617_v10, %v617_v10 }
 0x224   :  { %2850 = vmatpush1.bf16.msra.mxu1 %v5335_v20  ;;  %2769 = vmatprep.subr.bf16.mxu0 %v5340_v21  ;;  %v4567_v20 = vcombine.low %v617_v10, %v617_v10  ;;  %v2401_v21 = vsel %vm2375_vm2, %v4565_v19, 0 }
 0x225   :  { %2851 = vmatprep.subr.bf16.mxu1 %v5343_v22  ;;  %v5414_v22 = vld [vmem:[#allocation6 + $0x370] ss:$52 sps:$4 sm:$0xff]  }
 0x227   :  { %2770 = vmatpush1.bf16.msra.mxu0 %v5338_v23  ;;  %v2407_v23 = vsel %vm2375_vm2, %v4567_v20, 0  ;;  %v5451_v20 = vld [vmem:[%s6324_s5 + $0x88] sm:$0xff]  }
 0x228   :  { %2852 = vmatpush1.bf16.msra.mxu1 %v5341_v24  ;;  %2771 = vmatprep.subr.bf16.mxu0 %v5346_v25  ;;  %v5415_v24 = vld [vmem:[#allocation6 + $0x30] ss:$52 sps:$4 sm:$0xff]  }
 0x229   :  { %2853 = vmatprep.subr.bf16.mxu1 %v5349_v27  ;;  %v5416_v25 = vld [vmem:[#allocation6 + $0x6b0] ss:$52 sps:$4 sm:$0xff]   ;;  %v5417_v27 = vld [vmem:[#allocation6 + $0x3d8] ss:$52 sps:$4 sm:$0xff]  }
 0x22b   :  { %2772 = vmatpush1.bf16.msra.mxu0 %v5344_v28  ;;  %v5418_v28 = vld [vmem:[#allocation6 + $0x98] ss:$52 sps:$4 sm:$0xff]  }
 0x22c   :  { %2854 = vmatpush1.bf16.msra.mxu1 %v5347_v29  ;;  %2773 = vmatprep.subr.bf16.mxu0 %v5352_v30  ;;  %v5419_v29 = vld [vmem:[#allocation6 + $0x718] ss:$52 sps:$4 sm:$0xff]   ;;  %v5420_v30 = vld [vmem:[#allocation6 + $0x440] ss:$52 sps:$4 sm:$0xff]  }
 0x22d   :  { %2855 = vmatprep.subr.bf16.mxu1 %v5355_v31 }
 0x22f   :  { %2774 = vmatpush1.bf16.msra.mxu0 %v5350_v32 }
 0x230   :  { %2856 = vmatpush1.bf16.msra.mxu1 %v5353_v33  ;;  %2784 = vmatprep.subr.bf16.mxu0 %v5358_v35 }
 0x231   :  { %2866 = vmatprep.subr.bf16.mxu1 %v5361_v37 }
 0x232   :  { %2776 = vmatmul.mubr.bf16.vlgmr.msra.gmra.mrb[12].mxu0 %v5888_v36 }
 0x233   :  { %2858 = vmatmul.mubr.bf16.vlgmr.msra.gmra.mrb[12].mxu1 %v5888_v36  ;;  %2785 = vmatpush1.bf16.msra.mxu0 %v5356_v38 }
 0x234   :  { %4579 = vmatprep.mubr.msk.bf16.mxu0 %vm2371_vm1, %v5892_v41  ;;  %2867 = vmatpush1.bf16.msra.mxu1 %v5359_v39  ;;  %v5421_v39 = vld [vmem:[#allocation6 + $0x100] ss:$52 sps:$4 sm:$0xff]  }
 0x235   :  { %4581 = vmatprep.mubr.msk.bf16.mxu1 %vm2371_vm1, %v5892_v41  ;;  %2786 = vmatprep.subr.bf16.mxu0 %v5364_v40 }
 0x236   :  { %2868 = vmatprep.subr.bf16.mxu1 %v5367_v42  ;;  %v5422_v42 = vld [vmem:[#allocation6 + $0x780] ss:$52 sps:$4 sm:$0xff]  }
 0x237   :  { %2787 = vmatpush1.bf16.msra.mxu0 %v5362_v43  ;;  %v5423_v43 = vld [vmem:[#allocation6 + $0x4a8] ss:$52 sps:$4 sm:$0xff]  }
 0x238   :  { %2869 = vmatpush1.bf16.msra.mxu1 %v5365_v44  ;;  %2788 = vmatprep.subr.bf16.mxu0 %v5370_v45  ;;  %v5425_v44 = vld [vmem:[#allocation6 + $0x7e8] ss:$52 sps:$4 sm:$0xff]   ;;  %v5426_v45 = vld [vmem:[#allocation6 + $0x510] ss:$52 sps:$4 sm:$0xff]  }
 0x239   :  { %2870 = vmatprep.subr.bf16.mxu1 %v5373_v46  ;;  %v5427_v46 = vld [vmem:[#allocation6 + $0x1d0] ss:$52 sps:$4 sm:$0xff]  }
 0x23b   :  { %2789 = vmatpush1.bf16.msra.mxu0 %v5368_v47  ;;  %v5428_v47 = vld [vmem:[#allocation6 + $0x850] ss:$52 sps:$4 sm:$0xff]  }
 0x23c   :  { %2871 = vmatpush1.bf16.msra.mxu1 %v5371_v48  ;;  %2790 = vmatprep.subr.bf16.mxu0 %v5376_v49  ;;  %v5429_v48 = vld [vmem:[#allocation6 + $0x578] ss:$52 sps:$4 sm:$0xff]   ;;  %v5954_v49 = vld [vmem:[#allocation7] sm:$0xff] }
 0x23d   :  { %2872 = vmatprep.subr.bf16.mxu1 %v5379_v50  ;;  %v5430_v50 = vld [vmem:[#allocation6 + $0x238] ss:$52 sps:$4 sm:$0xff]  }
 0x23f   :  { %2791 = vmatpush1.bf16.msra.mxu0 %v5374_v51  ;;  %v5431_v51 = vld [vmem:[#allocation6 + $0x8b8] ss:$52 sps:$4 sm:$0xff]  }
 0x240   :  { %2873 = vmatpush1.bf16.msra.mxu1 %v5377_v52  ;;  %2792 = vmatprep.subr.bf16.mxu0 %v5382_v53  ;;  %v5432_v52 = vld [vmem:[#allocation6 + $0x5e0] ss:$52 sps:$4 sm:$0xff]   ;;  %v630_v53 = vrot.slane %v5954_v49, %v5873_v14 }
 0x241   :  { %2874 = vmatprep.subr.bf16.mxu1 %v5385_v54  ;;  %v5433_v54 = vld [vmem:[#allocation6 + $0x2a0] ss:$52 sps:$4 sm:$0xff]  }
 0x243   :  { %2793 = vmatpush1.bf16.msra.mxu0 %v5380_v55  ;;  %v5434_v55 = vld [vmem:[#allocation6 + $0x920] ss:$52 sps:$4 sm:$0xff]  }
 0x244   :  { %2875 = vmatpush1.bf16.msra.mxu1 %v5383_v56  ;;  %2794 = vmatprep.subr.bf16.mxu0 %v5388_v57  ;;  %v5435_v56 = vld [vmem:[#allocation6 + $0x648] ss:$52 sps:$4 sm:$0xff]  }
 0x245   :  { %2876 = vmatprep.subr.bf16.mxu1 %v5391_v58  ;;  %v5436_v58 = vld [vmem:[#allocation6 + $0x308] ss:$52 sps:$4 sm:$0xff]  }
 0x247   :  { %2795 = vmatpush1.bf16.msra.mxu0 %v5386_v59  ;;  %v5437_v59 = vld [vmem:[#allocation6 + $0x988] ss:$52 sps:$4 sm:$0xff]  }
 0x248   :  { %2877 = vmatpush1.bf16.msra.mxu1 %v5389_v60  ;;  %2796 = vmatprep.subr.bf16.mxu0 %v5394_v62  ;;  %v5438_v60 = vld [vmem:[%s6324_s5 + $0x40] sm:$0xff]  }
 0x249   :  { %2878 = vmatprep.subr.bf16.mxu1 %v5397_v63  ;;  %v638_v63 = vrot.slane %v5954_v49, %v5876_v15 }
 0x24b   :  { %2797 = vmatpush1.bf16.msra.mxu0 %v5392_v1  ;;  %v5440_v1 = vld [vmem:[%s6324_s5] sm:$0xff]  }
 0x24c   :  { %2879 = vmatpush1.bf16.msra.mxu1 %v5395_v2  ;;  %2798 = vmatprep.subr.bf16.mxu0 %v5400_v3  ;;  %v5439_v2 = vld [vmem:[#allocation6 + $0x9f0] ss:$52 sps:$4 sm:$0xff]  }
 0x24d   :  { %2880 = vmatprep.subr.bf16.mxu1 %v5403_v4  ;;  %v5441_v3 = vld [vmem:[%s6324_s5 + $0x48] sm:$0xff]  }
 0x24f   :  { %2799 = vmatpush1.bf16.msra.mxu0 %v5398_v5  ;;  %v5442_v5 = vld [vmem:[#allocation6 + $0xa58] ss:$0 sps:$4 sm:$0xff]  }
 0x250   :  { %2881 = vmatpush1.bf16.msra.mxu1 %v5401_v6  ;;  %2800 = vmatprep.subr.bf16.mxu0 %v5406_v7  ;;  %v5443_v7 = vld [vmem:[%s6324_s5 + $0x8] sm:$0xff]   ;;  %v2413_v9 = vsel %vm2375_vm2, %v5442_v5, 0 }
 0x251   :  { %2882 = vmatprep.subr.bf16.mxu1 %v5409_v8  ;;  %v5444_v8 = vld [vmem:[%s6324_s5 + $0x50] sm:$0xff]   ;;  %v5492_v5 = vld [vmem:[%s6324_s5 + $0x168] sm:$0xff]  }
 0x253   :  { %2801 = vmatpush1.bf16.msra.mxu0 %v5404_v16  ;;  %v5446_v16 = vld [vmem:[%s6324_s5 + $0x10] sm:$0xff]  }
 0x254   :  { %2883 = vmatpush1.bf16.msra.mxu1 %v5407_v17  ;;  %4578 = vmatprep.subr.msk.bf16.mxu0 %vm2375_vm2, %v4566_v18  ;;  %v5447_v17 = vld [vmem:[%s6324_s5 + $0x80] sm:$0xff]   ;;  %v5449_v18 = vld [vmem:[%s6324_s5 + $0xc8] sm:$0xff]  }
 0x255   :  { %4580 = vmatprep.subr.msk.bf16.mxu1 %vm2375_vm2, %v4568_v12  ;;  %v5450_v12 = vld [vmem:[%s6324_s5 + $0x18] sm:$0xff]  }
 0x257   :  { %2803 = vmatpush1.bf16.msra.mxu0 %v2401_v21  ;;  %v5452_v21 = vld [vmem:[%s6324_s5 + $0x60] sm:$0xff]  }
 0x258   :  { %2885 = vmatpush1.bf16.msra.mxu1 %v2407_v23  ;;  %4694 = vmatprep.subr.bf16.mxu0 %v5414_v22  ;;  %v5454_v22 = vld [vmem:[%s6324_s5 + $0x20] sm:$0xff]   ;;  %v5455_v23 = vld [vmem:[%s6324_s5 + $0x90] sm:$0xff]  }
 0x259   :  { %2947 = vmatprep.subr.bf16.mxu1 %v5723_v0 }
 0x25a   :  { %2817 = vmatmul.mubr.bf16.vlgmr.msra.gmra.mrb[12].mxu0 %v5910_v26 }
 0x25b   :  { %2899 = vmatmul.mubr.bf16.vlgmr.msra.gmra.mrb[12].mxu1 %v5910_v26  ;;  %4695 = vmatpush3.bf16.msra.mxu0 %v5415_v24  ;;  %v5456_v24 = vld [vmem:[%s6324_s5 + $0x68] sm:$0xff]  }
 0x25c   :  { %2939 = vmatprep.mubr.bf16.mxu0 %v5886_v34  ;;  %2948 = vmatpush1.bf16.msra.mxu1 %v5416_v25  ;;  %v5457_v25 = vld [vmem:[%s6324_s5 + $0xd8] sm:$0xff]  }
 0x25d   :  { %4582 = vmatprep.mubr.msk.bf16.mxu1 %vm2371_vm1, %v5892_v41  ;;  %v5946_v31 = vpop.f32.mrb[4].mxu0  ;;  %v5948_v32 = vpop.f32.mrb[4].mxu1  ;;  %4696 = vmatprep.subr.bf16.mxu0 %v5417_v27  ;;  %v5424_v41 = vld [vmem:[#allocation6 + $0x168] ss:$52 sps:$4 sm:$0xff]  }
 0x25e   :  { %v2492_v33 = vpop.f32.mrb[5].mxu0  ;;  %v2574_v35 = vpop.f32.mrb[5].mxu1  ;;  %2949 = vmatprep.subr.bf16.mxu1 %v5723_v0  ;;  %v5458_v27 = vld [vmem:[%s6324_s5 + $0x28] sm:$0xff]  }
 0x25f   :  { %v2494_v37 = vpop.f32.mrb[6].mxu0  ;;  %v2576_v38 = vpop.f32.mrb[6].mxu1  ;;  %4697 = vmatpush3.bf16.msra.mxu0 %v5418_v28  ;;  %v4895_v57 = vadd.f32 %v2492_v33, %v630_v53  ;;  %v4897_v6 = vadd.f32 %v2574_v35, %v638_v63  ;;  %v626_v28 = vrot.slane %v5954_v49, %v5870_v13  ;;  %v5461_v33 = vld [vmem:[%s6324_s5 + $0xe0] sm:$0xff]   ;;  %v5462_v35 = vld [vmem:[%s6324_s5 + $0x30] sm:$0xff]   ;;  %v5471_v53 = vld [vmem:[%s6324_s5 + $0xb8] sm:$0xff]  }
 0x260   :  { %2950 = vmatpush1.bf16.msra.mxu1 %v5419_v29  ;;  %v2495_v34 = vpop.f32.mrb[7].mxu0  ;;  %v2577_v40 = vpop.f32.mrb[7].mxu1  ;;  %4698 = vmatprep.subr.bf16.mxu0 %v5420_v30  ;;  %v5459_v29 = vld [vmem:[%s6324_s5 + $0x98] sm:$0xff]   ;;  %v5460_v30 = vld [vmem:[%s6324_s5 + $0x70] sm:$0xff]   ;;  %v5463_v38 = vld [vmem:[%s6324_s5 + $0xa0] sm:$0xff]  }
 0x261   :  { %2951 = vmatprep.subr.bf16.mxu1 %v5723_v0  ;;  %v2988_v62 = vmax.f32 %v4895_v57, 0.0  ;;  %v2990_v10 = vmax.f32 %v4897_v6, 0.0  ;;  %v4894_v37 = vadd.f32 %v5946_v31, %v626_v28  ;;  %v5465_v34 = vld [vmem:[%s6324_s5 + $0xe8] sm:$0xff]   ;;  %v5466_v31 = vld [vmem:[%s6324_s5 + $0x38] sm:$0xff]   ;;  %v5475_v57 = vld [vmem:[%s6324_s5 + $0x180] sm:$0xff]   ;;  %v653_v28 = vsub.s32 7, %v5865_v11 }
 0x262   :  { %v5479_v63 = vld [vmem:[%s6324_s5 + $0x188] sm:$0xff]   ;;  %v5485_v6 = vld [vmem:[%s6324_s5 + $0x1d8] sm:$0xff]  }
 0x263   :  { %4699 = vmatpush3.bf16.msra.mxu0 %v5421_v39  ;;  %v3001_v4 = vpack.c.bf16 %v2988_v62, %v2988_v62  ;;  %v3003_v19 = vpack.c.bf16 %v2990_v10, %v2990_v10  ;;  %v5464_v39 = vld [vmem:[%s6324_s5 + $0x78] sm:$0xff]   ;;  %v2987_v40 = vmax.f32 %v4894_v37, 0.0  ;;  %v5498_v10 = vld [vmem:[%s6324_s5 + $0x130] sm:$0xff]  }
 0x264   :  { %2952 = vmatpush1.bf16.msra.mxu1 %v5422_v42  ;;  %4700 = vmatprep.subr.bf16.mxu0 %v5423_v43  ;;  %v5467_v42 = vld [vmem:[%s6324_s5 + $0xa8] sm:$0xff]   ;;  %v5472_v43 = vld [vmem:[%s6324_s5 + $0x140] sm:$0xff]   ;;  %v5486_v62 = vld [vmem:[%s6324_s5 + $0x118] sm:$0xff]  }
 0x265   :  { %2953 = vmatprep.subr.bf16.mxu1 %v5723_v0 }
 0x267   :  { %4701 = vmatpush3.bf16.msra.mxu0 %v5424_v41  ;;  %v634_v41 = vrot.slane %v5954_v49, %v5901_v61 }
 0x268   :  { %2954 = vmatpush1.bf16.msra.mxu1 %v5425_v44  ;;  %4702 = vmatprep.subr.bf16.mxu0 %v5426_v45  ;;  %v5468_v44 = vld [vmem:[%s6324_s5 + $0xf0] sm:$0xff]   ;;  %v5474_v45 = vld [vmem:[%s6324_s5 + $0x100] sm:$0xff]  }
 0x269   :  { %2955 = vmatprep.subr.bf16.mxu1 %v5723_v0 }
 0x26b   :  { %4703 = vmatpush3.bf16.msra.mxu0 %v5427_v46  ;;  %v3000_v46 = vpack.c.bf16 %v2987_v40, %v2987_v40 }
 0x26c   :  { %2956 = vmatpush1.bf16.msra.mxu1 %v5428_v47  ;;  %4704 = vmatprep.subr.bf16.mxu0 %v5429_v48  ;;  %v5469_v47 = vld [vmem:[%s6324_s5 + $0xb0] sm:$0xff]   ;;  %v5476_v48 = vld [vmem:[%s6324_s5 + $0x148] sm:$0xff]  }
 0x26d   :  { %2957 = vmatprep.subr.bf16.mxu1 %v5723_v0 }
 0x26f   :  { %4705 = vmatpush3.bf16.msra.mxu0 %v5430_v50  ;;  %v4896_v50 = vadd.f32 %v5948_v32, %v634_v41  ;;  %v5480_v32 = vld [vmem:[%s6324_s5 + $0x150] sm:$0xff]  }
 0x270   :  { %2958 = vmatpush1.bf16.msra.mxu1 %v5431_v51  ;;  %4706 = vmatprep.subr.bf16.mxu0 %v5432_v52  ;;  %v5470_v51 = vld [vmem:[%s6324_s5 + $0xf8] sm:$0xff]   ;;  %v5478_v52 = vld [vmem:[%s6324_s5 + $0x108] sm:$0xff]  }
 0x271   :  { %2959 = vmatprep.subr.bf16.mxu1 %v5723_v0 }
 0x273   :  { %4707 = vmatpush3.bf16.msra.mxu0 %v5433_v54  ;;  %v2989_v54 = vmax.f32 %v4896_v50, 0.0 }
 0x274   :  { %2960 = vmatpush1.bf16.msra.mxu1 %v5434_v55  ;;  %4708 = vmatprep.subr.bf16.mxu0 %v5435_v56  ;;  %v5473_v55 = vld [vmem:[%s6324_s5 + $0x1c0] sm:$0xff]   ;;  %v5482_v56 = vld [vmem:[%s6324_s5 + $0x110] sm:$0xff]  }
 0x275   :  { %2961 = vmatprep.subr.bf16.mxu1 %v5723_v0 }
 0x277   :  { %4709 = vmatpush3.bf16.msra.mxu0 %v5436_v58  ;;  %v5484_v58 = vld [vmem:[%s6324_s5 + $0x158] sm:$0xff]  }
 0x278   :  { %2962 = vmatpush1.bf16.msra.mxu1 %v5437_v59  ;;  %4716 = vmatprep.subr.bf16.mxu0 %v5438_v60  ;;  %v3002_v59 = vpack.c.bf16 %v2989_v54, %v2989_v54  ;;  %v5477_v60 = vld [vmem:[%s6324_s5 + $0x1c8] sm:$0xff]   ;;  %v5507_v54 = vld [vmem:[%s6324_s5 + $0x280] sm:$0xff]  }
 0x279   :  { %2963 = vmatprep.subr.bf16.mxu1 %v5723_v0 }
 0x27a   :  { %2940 = vmatmul.mubr.bf16.vlgmr.msra.gmra.mrb[16].mxu0 %v5888_v36  ;;  %v5445_v36 = vld [vmem:[%s6324_s5 + $0xc0] sm:$0xff]  }
 0x27b   :  { %4717 = vmatpush3.bf16.msra.mxu0 %v5440_v1  ;;  %3884 = vmatprep.mubr.bf16.mxu0 %v3001_v4  ;;  %v5488_v1 = vld [vmem:[%s6324_s5 + $0x160] sm:$0xff]   ;;  %v5483_v4 = vld [vmem:[%s6324_s5 + $0x190] sm:$0xff]  }
 0x27c   :  { %2964 = vmatpush1.bf16.msra.mxu1 %v5439_v2  ;;  %4718 = vmatprep.subr.bf16.mxu0 %v5441_v3  ;;  %v5481_v2 = vld [vmem:[%s6324_s5 + $0x1d0] sm:$0xff]   ;;  %v5490_v3 = vld [vmem:[%s6324_s5 + $0x120] sm:$0xff]  }
 0x27d   :  { %2965 = vmatprep.subr.bf16.mxu1 %v5723_v0  ;;  %v5448_v0 = vld [vmem:[%s6324_s5 + $0x58] sm:$0xff]  }
 0x27f   :  { %4719 = vmatpush3.bf16.msra.mxu0 %v5443_v7  ;;  %v5494_v7 = vld [vmem:[%s6324_s5 + $0x128] sm:$0xff]  }
 0x280   :  { %2966 = vmatpush1.bf16.msra.mxu1 %v2413_v9  ;;  %4720 = vmatprep.subr.bf16.mxu0 %v5444_v8  ;;  %v5487_v8 = vld [vmem:[%s6324_s5 + $0x198] sm:$0xff]   ;;  %v5496_v9 = vld [vmem:[%s6324_s5 + $0x170] sm:$0xff]  }
 0x281   :  { %4738 = vmatprep.subr.bf16.mxu1 %v5445_v36  ;;  %v5489_v36 = vld [vmem:[%s6324_s5 + $0x1e0] sm:$0xff]  }
 0x283   :  { %2980 = vmatmul.mubr.bf16.vlgmr.msra.gmra.mrb[16].mxu1 %v5910_v26  ;;  %4721 = vmatpush3.bf16.msra.mxu0 %v5446_v16  ;;  %v5453_v26 = vld [vmem:[%s6324_s5 + $0xd0] sm:$0xff]   ;;  %v5491_v16 = vld [vmem:[%s6324_s5 + $0x1a0] sm:$0xff]  }
 0x284   :  { %4739 = vmatpush3.bf16.msra.mxu1 %v5447_v17  ;;  %3924 = vmatprep.mubr.bf16.mxu1 %v3003_v19  ;;  %v5500_v17 = vld [vmem:[%s6324_s5 + $0x178] sm:$0xff]   ;;  %v5495_v19 = vld [vmem:[%s6324_s5 + $0x1a8] sm:$0xff]  }
 0x285   :  { %4722 = vmatprep.subr.bf16.mxu0 %v5448_v0  ;;  %4740 = vmatprep.subr.bf16.mxu1 %v5449_v18  ;;  %v5493_v0 = vld [vmem:[%s6324_s5 + $0x1e8] sm:$0xff]   ;;  %v5502_v18 = vld [vmem:[%s6324_s5 + $0x138] sm:$0xff]  }
 0x287   :  { %4723 = vmatpush3.bf16.msra.mxu0 %v5450_v12  ;;  %v5504_v12 = vld [vmem:[%s6324_s5 + $0x240] sm:$0xff]  }
 0x288   :  { %4741 = vmatpush3.bf16.msra.mxu1 %v5451_v20  ;;  %4724 = vmatprep.subr.bf16.mxu0 %v5452_v21  ;;  %v5497_v20 = vld [vmem:[%s6324_s5 + $0x1f0] sm:$0xff]  }
 0x289   :  { %4742 = vmatprep.subr.bf16.mxu1 %v5453_v26  ;;  %v5499_v21 = vld [vmem:[%s6324_s5 + $0x1b0] sm:$0xff]   ;;  %v5501_v26 = vld [vmem:[%s6324_s5 + $0x1f8] sm:$0xff]  }
 0x28b   :  { %4725 = vmatpush3.bf16.msra.mxu0 %v5454_v22  ;;  %v5503_v22 = vld [vmem:[%s6324_s5 + $0x1b8] sm:$0xff]  }
 0x28c   :  { %4743 = vmatpush3.bf16.msra.mxu1 %v5455_v23  ;;  %4726 = vmatprep.subr.bf16.mxu0 %v5456_v24  ;;  %v5505_v23 = vld [vmem:[%s6324_s5 + $0x2c0] sm:$0xff]   ;;  %v641_v24 = vsub.s32 4, %v5865_v11 }
 0x28d   :  { %4744 = vmatprep.subr.bf16.mxu1 %v5457_v25  ;;  %v649_v25 = vsub.s32 6, %v5865_v11 }
 0x28f   :  { %4727 = vmatpush3.bf16.msra.mxu0 %v5458_v27  ;;  %v645_v27 = vsub.s32 5, %v5865_v11 }
 0x290   :  { %4745 = vmatpush3.bf16.msra.mxu1 %v5459_v29  ;;  %4728 = vmatprep.subr.bf16.mxu0 %v5460_v30  ;;  %v642_v29 = vrot.slane %v5954_v49, %v641_v24  ;;  %v650_v30 = vrot.slane %v5954_v49, %v649_v25  ;;  %v620_v25 = vld [vmem:[#allocation7 + $0x8] sm:$0x1f] }
 0x291   :  { %4746 = vmatprep.subr.bf16.mxu1 %v5461_v33  ;;  %v646_v33 = vrot.slane %v5954_v49, %v645_v27  ;;  %v658_v27 = vrot.slane %v620_v25, %v5870_v13 }
 0x293   :  { %4729 = vmatpush3.bf16.msra.mxu0 %v5462_v35  ;;  %v654_v35 = vrot.slane %v5954_v49, %v653_v28  ;;  %v5506_v49 = vld [vmem:[%s6324_s5 + $0x200] sm:$0xff]   ;;  %v666_v28 = vrot.slane %v620_v25, %v5901_v61 }
 0x294   :  { %4747 = vmatpush3.bf16.msra.mxu1 %v5463_v38  ;;  %4730 = vmatprep.subr.bf16.mxu0 %v5464_v39 }
 0x295   :  { %4748 = vmatprep.subr.bf16.mxu1 %v5465_v34 }
 0x297   :  { %4731 = vmatpush3.bf16.msra.mxu0 %v5466_v31 }
 0x298   :  { %4749 = vmatpush3.bf16.msra.mxu1 %v5467_v42  ;;  %4760 = vmatprep.subr.bf16.mxu0 %v5472_v43 }
 0x299   :  { %4750 = vmatprep.subr.bf16.mxu1 %v5468_v44 }
 0x29a   :  { %3885 = vmatmul.mubr.bf16.vlgmr.msra.gmra.mrb[20].mxu0 %v3000_v46 }
 0x29b   :  { %4761 = vmatpush3.bf16.msra.mxu0 %v5474_v45 }
 0x29c   :  { %4751 = vmatpush3.bf16.msra.mxu1 %v5469_v47  ;;  %4762 = vmatprep.subr.bf16.mxu0 %v5476_v48 }
 0x29d   :  { %4752 = vmatprep.subr.bf16.mxu1 %v5470_v51 }
 0x29f   :  { %4763 = vmatpush3.bf16.msra.mxu0 %v5478_v52 }
 0x2a0   :  { %4753 = vmatpush3.bf16.msra.mxu1 %v5471_v53  ;;  %4764 = vmatprep.subr.bf16.mxu0 %v5480_v32 }
 0x2a1   :  { %4782 = vmatprep.subr.bf16.mxu1 %v5473_v55  ;;  %v5508_v55 = vld [vmem:[%s6324_s5 + $0x248] sm:$0xff]  }
 0x2a3   :  { %3925 = vmatmul.mubr.bf16.vlgmr.msra.gmra.mrb[20].mxu1 %v3002_v59  ;;  %4765 = vmatpush3.bf16.msra.mxu0 %v5482_v56  ;;  %v5511_v59 = vld [vmem:[%s6324_s5 + $0x288] sm:$0xff]  }
 0x2a4   :  { %4783 = vmatpush3.bf16.msra.mxu1 %v5475_v57  ;;  %4766 = vmatprep.subr.bf16.mxu0 %v5484_v58  ;;  %v5509_v57 = vld [vmem:[%s6324_s5 + $0x2c8] sm:$0xff]  }
 0x2a5   :  { %4784 = vmatprep.subr.bf16.mxu1 %v5477_v60  ;;  %v5510_v58 = vld [vmem:[%s6324_s5 + $0x208] sm:$0xff]   ;;  %v5512_v60 = vld [vmem:[%s6324_s5 + $0x250] sm:$0xff]  }
 0x2a7   :  { %4767 = vmatpush3.bf16.msra.mxu0 %v5486_v62  ;;  %v5513_v62 = vld [vmem:[%s6324_s5 + $0x2d0] sm:$0xff]  }
 0x2a8   :  { %4785 = vmatpush3.bf16.msra.mxu1 %v5479_v63  ;;  %4768 = vmatprep.subr.bf16.mxu0 %v5488_v1  ;;  %v5514_v63 = vld [vmem:[%s6324_s5 + $0x210] sm:$0xff]  }
 0x2a9   :  { %4786 = vmatprep.subr.bf16.mxu1 %v5481_v2  ;;  %v5515_v1 = vld [vmem:[%s6324_s5 + $0x290] sm:$0xff]   ;;  %v5516_v2 = vld [vmem:[%s6324_s5 + $0x258] sm:$0xff]  }
 0x2ab   :  { %4769 = vmatpush3.bf16.msra.mxu0 %v5490_v3  ;;  %v5517_v3 = vld [vmem:[%s6324_s5 + $0x2d8] sm:$0xff]  }
 0x2ac   :  { %4787 = vmatpush3.bf16.msra.mxu1 %v5483_v4  ;;  %4770 = vmatprep.subr.bf16.mxu0 %v5492_v5  ;;  %v5518_v4 = vld [vmem:[%s6324_s5 + $0x218] sm:$0xff]  }
 0x2ad   :  { %4788 = vmatprep.subr.bf16.mxu1 %v5485_v6  ;;  %v5519_v5 = vld [vmem:[%s6324_s5 + $0x298] sm:$0xff]   ;;  %v5520_v6 = vld [vmem:[%s6324_s5 + $0x260] sm:$0xff]  }
 0x2af   :  { %4771 = vmatpush3.bf16.msra.mxu0 %v5494_v7  ;;  %v5521_v7 = vld [vmem:[%s6324_s5 + $0x2e0] sm:$0xff]  }
 0x2b0   :  { %4789 = vmatpush3.bf16.msra.mxu1 %v5487_v8  ;;  %4772 = vmatprep.subr.bf16.mxu0 %v5496_v9  ;;  %v5522_v8 = vld [vmem:[%s6324_s5 + $0x220] sm:$0xff]  }
 0x2b1   :  { %4790 = vmatprep.subr.bf16.mxu1 %v5489_v36  ;;  %v5523_v9 = vld [vmem:[%s6324_s5 + $0x2a0] sm:$0xff]   ;;  %v5524_v36 = vld [vmem:[%s6324_s5 + $0x268] sm:$0xff]  }
 0x2b3   :  { %4773 = vmatpush3.bf16.msra.mxu0 %v5498_v10  ;;  %v5525_v10 = vld [vmem:[%s6324_s5 + $0x2e8] sm:$0xff]  }
 0x2b4   :  { %4791 = vmatpush3.bf16.msra.mxu1 %v5491_v16  ;;  %4774 = vmatprep.subr.bf16.mxu0 %v5500_v17  ;;  %v5526_v16 = vld [vmem:[%s6324_s5 + $0x228] sm:$0xff]  }
 0x2b5   :  { %4792 = vmatprep.subr.bf16.mxu1 %v5493_v0  ;;  %v5527_v17 = vld [vmem:[%s6324_s5 + $0x2a8] sm:$0xff]   ;;  %v5528_v0 = vld [vmem:[%s6324_s5 + $0x270] sm:$0xff]  }
 0x2b7   :  { %4775 = vmatpush3.bf16.msra.mxu0 %v5502_v18  ;;  %v5529_v18 = vld [vmem:[%s6324_s5 + $0x2f0] sm:$0xff]  }
 0x2b8   :  { %4793 = vmatpush3.bf16.msra.mxu1 %v5495_v19  ;;  %4804 = vmatprep.subr.bf16.mxu0 %v5504_v12  ;;  %v5530_v19 = vld [vmem:[%s6324_s5 + $0x230] sm:$0xff]  }
 0x2b9   :  { %4794 = vmatprep.subr.bf16.mxu1 %v5497_v20  ;;  %v5531_v12 = vld [vmem:[%s6324_s5 + $0x2b0] sm:$0xff]   ;;  %v5532_v20 = vld [vmem:[%s6324_s5 + $0x278] sm:$0xff]  }
 0x2bc   :  { %4795 = vmatpush3.bf16.msra.mxu1 %v5499_v21  ;;  %v5533_v21 = vld [vmem:[%s6324_s5 + $0x2f8] sm:$0xff]  }
 0x2bd   :  { %4796 = vmatprep.subr.bf16.mxu1 %v5501_v26  ;;  %v5534_v26 = vld [vmem:[%s6324_s5 + $0x238] sm:$0xff]  }
 0x2c0   :  { %4797 = vmatpush3.bf16.msra.mxu1 %v5503_v22  ;;  %v5535_v22 = vld [vmem:[%s6324_s5 + $0x2b8] sm:$0xff]  }
 0x2c1   :  { %4826 = vmatprep.subr.bf16.mxu1 %v5505_v23  ;;  %v5724_v23 = vmov 0.0  }
 0x2c5   :  { %v2654_v37 = vpop.f32.mrb[8].mxu0 }
 0x2c6   :  { %v4898_v38 = vadd.f32 %v2654_v37, %v642_v29  ;;  %v2736_v39 = vpop.f32.mrb[8].mxu1  ;;  %v2656_v34 = vpop.f32.mrb[9].mxu0  ;;  %v662_v29 = vrot.slane %v620_v25, %v5873_v14  ;;  %v5536_v14 = vld [vmem:[%s6324_s5 + $0x300] sm:$0xff]  }
 0x2c7   :  { %v4900_v31 = vadd.f32 %v2736_v39, %v650_v30  ;;  %v4899_v40 = vadd.f32 %v2656_v34, %v646_v33  ;;  %v2738_v42 = vpop.f32.mrb[9].mxu1  ;;  %v2658_v43 = vpop.f32.mrb[10].mxu0  ;;  %v670_v30 = vrot.slane %v620_v25, %v5876_v15 }
 0x2c8   :  { %v2991_v41 = vmax.f32 %v4898_v38, 0.0  ;;  %v4901_v44 = vadd.f32 %v2738_v42, %v654_v35  ;;  %v2740_v45 = vpop.f32.mrb[10].mxu1  ;;  %v2659_v46 = vpop.f32.mrb[11].mxu0 }
 0x2c9   :  { %v2993_v47 = vmax.f32 %v4900_v31, 0.0  ;;  %v2992_v48 = vmax.f32 %v4899_v40, 0.0  ;;  %v2741_v50 = vpop.f32.mrb[11].mxu1 }
 0x2ca   :  { %v2994_v51 = vmax.f32 %v4901_v44, 0.0  ;;  %v3004_v53 = vpack.c.bf16 %v2991_v41, %v2991_v41 }
 0x2cb   :  { %v3005_v52 = vpack.c.bf16 %v2992_v48, %v2992_v48  ;;  %v3006_v56 = vpack.c.bf16 %v2993_v47, %v2993_v47 }
 0x2cc   :  { %v3007_v32 = vpack.c.bf16 %v2994_v51, %v2994_v51  ;;  %v5537_v51 = vld [vmem:[%s6324_s5 + $0x308] sm:$0xff]  }
 0x2cd   :  { %3964 = vmatprep.mubr.bf16.mxu0 %v3005_v52  ;;  %v5538_v52 = vld [vmem:[%s6324_s5 + $0x310] sm:$0xff]  }
 0x2ce   :  { %4004 = vmatprep.mubr.bf16.mxu1 %v3007_v32  ;;  %3965 = vmatmul.mubr.bf16.vlgmr.msra.gmra.mrb[24].mxu0 %v3004_v53  ;;  %v5540_v53 = vld [vmem:[%s6324_s5 + $0x320] sm:$0xff]   ;;  %v5541_v32 = vld [vmem:[%s6324_s5 + $0x328] sm:$0xff]  }
 0x2cf   :  { %4005 = vmatmul.mubr.bf16.vlgmr.msra.gmra.mrb[24].mxu1 %v3006_v56  ;;  %4805 = vmatpush3.bf16.msra.mxu0 %v5506_v49  ;;  %v5539_v49 = vld [vmem:[%s6324_s5 + $0x318] sm:$0xff]  }
 0x2d0   :  { %4827 = vmatpush3.bf16.msra.mxu1 %v5507_v54  ;;  %4806 = vmatprep.subr.bf16.mxu0 %v5508_v55  ;;  %v5542_v54 = vld [vmem:[%s6324_s5 + $0x330] sm:$0xff]  }
 0x2d1   :  { %4828 = vmatprep.subr.bf16.mxu1 %v5509_v57 }
 0x2d3   :  { %4807 = vmatpush3.bf16.msra.mxu0 %v5510_v58 }
 0x2d4   :  { %4829 = vmatpush3.bf16.msra.mxu1 %v5511_v59  ;;  %4808 = vmatprep.subr.bf16.mxu0 %v5512_v60  ;;  %v5543_v59 = vld [vmem:[%s6324_s5 + $0x338] sm:$0xff]  }
 0x2d5   :  { %4830 = vmatprep.subr.bf16.mxu1 %v5513_v62  ;;  %v674_v62 = vrot.slane %v620_v25, %v641_v24 }
 0x2d7   :  { %4809 = vmatpush3.bf16.msra.mxu0 %v5514_v63 }
 0x2d8   :  { %4831 = vmatpush3.bf16.msra.mxu1 %v5515_v1  ;;  %4810 = vmatprep.subr.bf16.mxu0 %v5516_v2 }
 0x2d9   :  { %4832 = vmatprep.subr.bf16.mxu1 %v5517_v3 }
 0x2db   :  { %4811 = vmatpush3.bf16.msra.mxu0 %v5518_v4 }
 0x2dc   :  { %4833 = vmatpush3.bf16.msra.mxu1 %v5519_v5  ;;  %4812 = vmatprep.subr.bf16.mxu0 %v5520_v6 }
 0x2dd   :  { %4834 = vmatprep.subr.bf16.mxu1 %v5521_v7 }
 0x2df   :  { %4813 = vmatpush3.bf16.msra.mxu0 %v5522_v8 }
 0x2e0   :  { %4835 = vmatpush3.bf16.msra.mxu1 %v5523_v9  ;;  %4814 = vmatprep.subr.bf16.mxu0 %v5524_v36 }
 0x2e1   :  { %4836 = vmatprep.subr.bf16.mxu1 %v5525_v10 }
 0x2e3   :  { %4815 = vmatpush3.bf16.msra.mxu0 %v5526_v16 }
 0x2e4   :  { %4837 = vmatpush3.bf16.msra.mxu1 %v5527_v17  ;;  %4816 = vmatprep.subr.bf16.mxu0 %v5528_v0  ;;  %v4583_v17 = vld [vmem:[#allocation9] ss:$0 sm:$0xff] }
 0x2e5   :  { %4838 = vmatprep.subr.bf16.mxu1 %v5529_v18 }
 0x2e7   :  { %4817 = vmatpush3.bf16.msra.mxu0 %v5530_v19 }
 0x2e8   :  { %4839 = vmatpush3.bf16.msra.mxu1 %v5531_v12  ;;  %4818 = vmatprep.subr.bf16.mxu0 %v5532_v20 }
 0x2e9   :  { %4840 = vmatprep.subr.bf16.mxu1 %v5533_v21  ;;  %v5544_v21 = vld [vmem:[#allocation10] sm:$0xff]  }
 0x2eb   :  { %4819 = vmatpush3.bf16.msra.mxu0 %v5534_v26  ;;  %v5545_v26 = vld [vmem:[#allocation10 + $0x8] sm:$0xff]  }
 0x2ec   :  { %4841 = vmatpush3.bf16.msra.mxu1 %v5535_v22  ;;  %4862 = vmatprep.subr.bf16.mxu0 %v5724_v23 }
 0x2ed   :  { %4882 = vmatprep.subr.bf16.mxu1 %v5724_v23 }
 0x32d   :  { %v2818_v33 = vpop.f32.mrb[12].mxu0 }
 0x32e   :  { %v4902_v35 = vadd.f32 %v2818_v33, %v658_v27  ;;  %v2900_v37 = vpop.f32.mrb[12].mxu1  ;;  %v2820_v38 = vpop.f32.mrb[13].mxu0 }
 0x32f   :  { %v4904_v39 = vadd.f32 %v2900_v37, %v666_v28  ;;  %v4903_v34 = vadd.f32 %v2820_v38, %v662_v29  ;;  %v2902_v31 = vpop.f32.mrb[13].mxu1  ;;  %v2822_v40 = vpop.f32.mrb[14].mxu0 }
 0x330   :  { %v2995_v42 = vmax.f32 %v4902_v35, 0.0  ;;  %v4905_v43 = vadd.f32 %v2902_v31, %v670_v30  ;;  %v2904_v41 = vpop.f32.mrb[14].mxu1  ;;  %v2823_v44 = vpop.f32.mrb[15].mxu0  ;;  %v5546_v31 = vld [vmem:[#allocation10 + $0x10] sm:$0xff]   ;;  %v5547_v40 = vld [vmem:[#allocation10 + $0x18] sm:$0xff]  }
 0x331   :  { %v2997_v45 = vmax.f32 %v4904_v39, 0.0  ;;  %v2996_v13 = vmax.f32 %v4903_v34, 0.0  ;;  %v2905_v46 = vpop.f32.mrb[15].mxu1 }
 0x332   :  { %v2998_v61 = vmax.f32 %v4905_v43, 0.0  ;;  %v3008_v15 = vpack.c.bf16 %v2995_v42, %v2995_v42 }
 0x333   :  { %v3009_v47 = vpack.c.bf16 %v2996_v13, %v2996_v13  ;;  %v3010_v50 = vpack.c.bf16 %v2997_v45, %v2997_v45 }
 0x334   :  { %v3011_v48 = vpack.c.bf16 %v2998_v61, %v2998_v61 }
 0x335   :  { %4044 = vmatprep.mubr.bf16.mxu0 %v3009_v47 }
 0x336   :  { %4084 = vmatprep.mubr.bf16.mxu1 %v3011_v48  ;;  %4045 = vmatmul.mubr.bf16.vlgmr.msra.gmra.mrb[28].mxu0 %v3008_v15 }
 0x337   :  { %4085 = vmatmul.mubr.bf16.vlgmr.msra.gmra.mrb[28].mxu1 %v3010_v50  ;;  %4863 = vmatpush3.bf16.msra.mxu0 %v5536_v14 }
 0x338   :  { %4864 = vmatprep.subr.bf16.mxu0 %v5724_v23  ;;  %4878 = vmatprep.mubr.msk.bf16.mxu0 %vm5725_vm3, %v5724_v23 }
 0x339   :  { %4890 = vmatprep.mubr.msk.bf16.mxu1 %vm5725_vm3, %v5724_v23  ;;  %4883 = vmatpush3.bf16.msra.mxu1 %v5544_v21 }
 0x33a   :  { %4884 = vmatprep.subr.bf16.mxu1 %v5724_v23 }
 0x33b   :  { %4865 = vmatpush3.bf16.msra.mxu0 %v5537_v51 }
 0x33c   :  { %4866 = vmatprep.subr.bf16.mxu0 %v5724_v23 }
 0x33d   :  { %4885 = vmatpush3.bf16.msra.mxu1 %v5545_v26 }
 0x33e   :  { %4886 = vmatprep.subr.bf16.mxu1 %v5724_v23 }
 0x33f   :  { %4867 = vmatpush3.bf16.msra.mxu0 %v5538_v52 }
 0x340   :  { %4868 = vmatprep.subr.bf16.mxu0 %v5724_v23 }
 0x341   :  { %4887 = vmatpush3.bf16.msra.mxu1 %v5546_v31 }
 0x342   :  { %4888 = vmatprep.subr.bf16.mxu1 %v5724_v23 }
 0x343   :  { %4869 = vmatpush3.bf16.msra.mxu0 %v5539_v49 }
 0x344   :  { %4870 = vmatprep.subr.bf16.mxu0 %v5724_v23 }
 0x345   :  { %4889 = vmatpush3.bf16.msra.mxu1 %v5547_v40 }
 0x347   :  { %4871 = vmatpush3.bf16.msra.mxu0 %v5540_v53 }
 0x348   :  { %4872 = vmatprep.subr.bf16.mxu0 %v5724_v23 }
 0x34b   :  { %4873 = vmatpush3.bf16.msra.mxu0 %v5541_v32 }
 0x34c   :  { %4874 = vmatprep.subr.bf16.mxu0 %v5724_v23 }
 0x34d   :  { %v4710_v55 = vpop.f32.mrb[16].mxu0 }
 0x34e   :  { %v4711_v56 = vpop.f32.mrb[17].mxu0 }
 0x34f   :  { %v4712_v57 = vadd.f32 %v4711_v56, %v4710_v55  ;;  %v4713_v58 = vpop.f32.mrb[18].mxu0  ;;  %4875 = vmatpush3.bf16.msra.mxu0 %v5542_v54  ;;  %v4688_v54 = vld [vmem:[#allocation12] ss:$0 sm:$0xff] }
 0x350   :  { %v4714_v60 = vpop.f32.mrb[19].mxu0  ;;  %4876 = vmatprep.subr.bf16.mxu0 %v5724_v23 }
 0x351   :  { %v2942_v63 = vadd.f32 %v4712_v57, %v674_v62 }
 0x353   :  { %4877 = vmatpush3.bf16.msra.mxu0 %v5543_v59 }
 0x356   :  { %v2981_v1 = vpop.f32.mrb[16].mxu1 }
 0x357   :  { %v2982_v2 = vadd.f32 %v2981_v1, %v2942_v63  ;;  %v2983_v3 = vpop.f32.mrb[17].mxu1 }
 0x358   :  { %v2984_v4 = vpop.f32.mrb[18].mxu1 }
 0x359   :  { %v2999_v5 = vmax.f32 %v2982_v2, 0.0  ;;  %v2985_v6 = vpop.f32.mrb[19].mxu1 }
 0x35b   :  { %v3012_v7 = vpack.c.bf16 %v2999_v5, %v2999_v5 }
 0x35d   :  { %4879 = vmatmul.mubr.bf16.vlgmr.msra.gmra.mrb[32].mxu0 %v3012_v7 }
 0x36d   :  { %v4732_v8 = vpop.f32.mrb[20].mxu0 }
 0x36e   :  { %v4733_v9 = vpop.f32.mrb[21].mxu0 }
 0x36f   :  { %v4734_v36 = vadd.f32 %v4733_v9, %v4732_v8  ;;  %v4735_v10 = vpop.f32.mrb[22].mxu0 }
 0x370   :  { %v4736_v16 = vpop.f32.mrb[23].mxu0 }
 0x371   :  { %v3887_v11 = vadd.f32 %v4734_v36, %v4583_v17 }
 0x376   :  { %v4754_v0 = vpop.f32.mrb[20].mxu1 }
 0x377   :  { %v4755_v18 = vpop.f32.mrb[21].mxu1 }
 0x378   :  { %v4756_v24 = vadd.f32 %v4755_v18, %v4754_v0  ;;  %v4757_v19 = vpop.f32.mrb[22].mxu1 }
 0x379   :  { %v4758_v12 = vpop.f32.mrb[23].mxu1 }
 0x37a   :  { %v3927_v20 = vadd.f32 %v4756_v24, %v3887_v11 }
 0x3a1   :  { %v4776_v22 = vpop.f32.mrb[24].mxu0 }
 0x3a2   :  { %v4798_v25 = vpop.f32.mrb[24].mxu1  ;;  %v4777_v27 = vpop.f32.mrb[25].mxu0 }
 0x3a3   :  { %v4778_v28 = vadd.f32 %v4777_v27, %v4776_v22  ;;  %v4799_v29 = vpop.f32.mrb[25].mxu1  ;;  %v4779_v30 = vpop.f32.mrb[26].mxu0 }
 0x3a4   :  { %v4800_v33 = vadd.f32 %v4799_v29, %v4798_v25  ;;  %v4801_v35 = vpop.f32.mrb[26].mxu1  ;;  %v4780_v37 = vpop.f32.mrb[27].mxu0 }
 0x3a5   :  { %v3967_v38 = vadd.f32 %v4778_v28, %v3927_v20  ;;  %v4802_v39 = vpop.f32.mrb[27].mxu1 }
 0x3a7   :  { %v4007_v34 = vadd.f32 %v4800_v33, %v3967_v38 }
 0x409   :  { %v4820_v42 = vpop.f32.mrb[28].mxu0 }
 0x40a   :  { %v4842_v43 = vpop.f32.mrb[28].mxu1  ;;  %v4821_v41 = vpop.f32.mrb[29].mxu0 }
 0x40b   :  { %v4822_v44 = vadd.f32 %v4821_v41, %v4820_v42  ;;  %v4843_v45 = vpop.f32.mrb[29].mxu1  ;;  %v4823_v13 = vpop.f32.mrb[30].mxu0 }
 0x40c   :  { %v4844_v46 = vadd.f32 %v4843_v45, %v4842_v43  ;;  %v4845_v61 = vpop.f32.mrb[30].mxu1  ;;  %v4824_v47 = vpop.f32.mrb[31].mxu0 }
 0x40d   :  { %v4047_v14 = vadd.f32 %v4822_v44, %v4007_v34  ;;  %v4846_v15 = vpop.f32.mrb[31].mxu1 }
 0x40f   :  { %v4087_v48 = vadd.f32 %v4844_v46, %v4047_v14 }
 0x430   :  { %v4126_v50 = vpop.f32.mrb[32].mxu0 }
 0x431   :  { %v4127_v51 = vadd.f32 %v4126_v50, %v4087_v48  ;;  %v4880_v52 = vpop.f32.mrb[33].mxu0 }
 0x432   :  { %v4129_v49 = vpop.f32.mrb[34].mxu0 }
 0x433   :  { %v4132_v53 = vmax.f32 %v4127_v51, 0.0  ;;  %v4881_v23 = vpop.f32.mrb[35].mxu0 }
 0x435   :  { %v4133_v32 = vpack.c.bf16 %v4132_v53, %v4132_v53 }
 0x437   :  { %4891 = vmatmul.mubr.msk.bf16.vlgmr.msra.gmra.mrb[32].mxu1 %vm4173_vm4, %v4133_v32 }
 0x50a   :  { %v4211_v55 = vpop.f32.mrb[32].mxu1 }
 0x50b   :  { %v4212_v56 = vadd.f32 %v4688_v54, %v4211_v55  ;;  %v4892_v57 = vpop.f32.mrb[33].mxu1 }
 0x50c   :  { %v4214_v58 = vpop.f32.mrb[34].mxu1 }
 0x50d   :  { %4217 = vst [vmem:[%s6328_s9] sm:$0xff] %v4212_v56  ;;  %v4893_v59 = vpop.f32.mrb[35].mxu1 }
 0x50e   :  { %4222 = vsyncpa [#allocation3], 1 }
 0x50f   :  { %4223 = vsyncpa [#allocation5], 1 }
 0x510   :  { %4224 = vsyncpa [#allocation8], 1 }
 0x511   :  { %4225 = vsyncpa [#allocation11], 1 }

</bundles_post_ra>
